<compile_context>
chip_gen: v5e
topology: v5e:2x2
jax: 0.10.0
libtpu: 0.0.40
codegen_flags: <defaults>
</compile_context>

<pallas_src>
import functools

import jax
import jax.numpy as jnp
from jax.experimental import pallas as pl
from jax.experimental.pallas import tpu as pltpu

LANE = 128
NEG_INF = -1e30


def _round_up(x, m):
    return ((x + m - 1) // m) * m


# --------------------------------------------------------------------------- #
# Pallas kernel
# --------------------------------------------------------------------------- #
def _bilstm_kernel(
    ids_ref,      # (T,)        int32   token ids (SMEM)
    emb_ref,      # (V, E)      float32 embedding table
    wih_ref,      # (E, 8H)     [fwd i|f|g|o | bwd i|f|g|o] input->gates
    b_ref,        # (1, 8H)     fused (b_ih + b_hh) for both directions
    whh_f_ref,    # (H, 4H)     forward  hidden->gates (dense)
    whh_b_ref,    # (H, 4H)     backward hidden->gates (dense)
    wlab_f_ref,   # (H, Op)     label weight, forward-hidden half
    wlab_b_ref,   # (H, Op)     label weight, backward-hidden half
    blab_ref,     # (1, Op)     label bias (-1e30 in padded class lanes)
    out_ref,      # (T, Op)     log-probabilities (padded classes ~ -1e30)
    emb_s,        # scratch (T, E): gathered embeddings
):
    T = out_ref.shape[0]
    H = whh_f_ref.shape[0]
    G = 4 * H

    # ---- In-kernel embedding gather: dynamic row loads driven by SMEM ids. ----
    for t in range(T):
        emb_s[pl.ds(t, 1), :] = emb_ref[pl.ds(ids_ref[t], 1), :]
    emb = emb_s[...]                                                   # (T, E)

    # ---- Fused input projection for both directions (bias folded in). ----
    xproj = jnp.dot(emb, wih_ref[...],
                    preferred_element_type=jnp.float32) + b_ref[...]  # (T, 8H)
    xf = xproj[:, :G]                                                  # (T, 4H)
    xb = xproj[:, G:]                                                  # (T, 4H)

    whh_f = whh_f_ref[...]
    whh_b = whh_b_ref[...]

    def cell(gates, c):
        # gates: (1, 4H) with dense [i|f|g|o] blocks.  Apply the nonlinearities
        # over the full row (one EUP push each), then slice per gate (XLU).
        sg = jax.nn.sigmoid(gates)
        th = jnp.tanh(gates)
        i = sg[:, 0 * H:1 * H]
        f = sg[:, 1 * H:2 * H]
        g = th[:, 2 * H:3 * H]
        o = sg[:, 3 * H:4 * H]
        c_new = f * c + i * g
        h_new = o * jnp.tanh(c_new)
        return h_new, c_new

    zeros = jnp.zeros((1, H), jnp.float32)
    h_f, c_f = zeros, zeros
    h_b, c_b = zeros, zeros
    hf_rows = [None] * T
    hb_rows = [None] * T

    # ---- Fused, fully-unrolled recurrence: forward step t and backward step
    #      T-1-t advance together (independent chains -> ILP).  Per-step hidden
    #      states stay in registers (no VMEM scratch round-trip). ----
    for t in range(T):
        tb = T - 1 - t
        g_f = xf[t:t + 1, :] + jnp.dot(h_f, whh_f, preferred_element_type=jnp.float32)
        g_b = xb[tb:tb + 1, :] + jnp.dot(h_b, whh_b, preferred_element_type=jnp.float32)
        h_f, c_f = cell(g_f, c_f)
        h_b, c_b = cell(g_b, c_b)
        hf_rows[t] = h_f
        hb_rows[tb] = h_b

    Hf = jnp.concatenate(hf_rows, axis=0)                              # (T, H)
    Hb = jnp.concatenate(hb_rows, axis=0)                              # (T, H)

    # ---- Label Linear (split fwd/bwd halves) + log_softmax on the padded
    #      class dim.  Padded classes have zero weight columns and a -1e30
    #      bias, so they contribute nothing to the softmax denominator. ----
    logits = (jnp.dot(Hf, wlab_f_ref[...], preferred_element_type=jnp.float32)
              + jnp.dot(Hb, wlab_b_ref[...], preferred_element_type=jnp.float32)
              + blab_ref[...])                                         # (T, Op)
    m = jnp.max(logits, axis=1, keepdims=True)
    shifted = logits - m
    lse = jnp.log(jnp.sum(jnp.exp(shifted), axis=1, keepdims=True))
    out_ref[...] = shifted - lse


# --------------------------------------------------------------------------- #
# Wrapper
# --------------------------------------------------------------------------- #
@functools.partial(jax.jit, static_argnames=("output_size",))
def bilstm_forward(sentence, packed, *, output_size):
    """sentence: (T,) int32 token ids. Returns (T, output_size) log-probs."""
    T = sentence.shape[0]
    E = packed["embedding"].shape[1]
    Op = packed["b_label"].shape[1]

    vmem = pl.BlockSpec(memory_space=pltpu.MemorySpace.VMEM)
    smem = pl.BlockSpec(memory_space=pltpu.MemorySpace.SMEM)

    out_padded = pl.pallas_call(
        _bilstm_kernel,
        out_shape=jax.ShapeDtypeStruct((T, Op), jnp.float32),
        in_specs=[smem] + [vmem] * 8,
        out_specs=vmem,
        scratch_shapes=[pltpu.VMEM((T, E), jnp.float32)],
    )(
        sentence.astype(jnp.int32),
        packed["embedding"],
        packed["wih_all"], packed["b_all"],
        packed["whh_f"], packed["whh_b"],
        packed["wlab_f"], packed["wlab_b"], packed["b_label"],
    )
    # Slice padded classes off outside the kernel (keeps kernel stores lane-dense).
    return out_padded[:, :output_size]


# --------------------------------------------------------------------------- #
# Parameter construction (PyTorch-shaped raw params + dense/padded packing)
# --------------------------------------------------------------------------- #
def init_raw_params(key, vocab_size, embedding_length, hidden_size, output_size):
    """Deterministic synthetic parameters with PyTorch nn.LSTM / nn.Linear shapes."""
    E, H, O = embedding_length, hidden_size, output_size
    ks = jax.random.split(key, 12)
    scale = 0.1

    def rnd(k, shape):
        return scale * jax.random.normal(k, shape, dtype=jnp.float32)

    return {
        "embedding": rnd(ks[0], (vocab_size, E)),
        # PyTorch layouts: weight_ih (4H, E), weight_hh (4H, H), biases (4H,).
        # Gate order i, f, g, o.
        "w_ih_f": rnd(ks[1], (4 * H, E)),
        "w_hh_f": rnd(ks[2], (4 * H, H)),
        "b_ih_f": rnd(ks[3], (4 * H,)),
        "b_hh_f": rnd(ks[4], (4 * H,)),
        "w_ih_b": rnd(ks[5], (4 * H, E)),
        "w_hh_b": rnd(ks[6], (4 * H, H)),
        "b_ih_b": rnd(ks[7], (4 * H,)),
        "b_hh_b": rnd(ks[8], (4 * H,)),
        "w_label": rnd(ks[9], (O, 2 * H)),   # nn.Linear(2H, O).weight
        "b_label": rnd(ks[10], (O,)),
    }


def pack_params(raw, hidden_size, output_size):
    """Transpose PyTorch-shaped params into dense kernel layouts.

    Gates are packed densely (4H lanes per direction, gate order i|f|g|o is
    already contiguous in the PyTorch layout so a transpose suffices).  The two
    directions' input projections and biases are fused along the lane axis.
    The label weight is split into forward/backward halves and its class dim is
    padded to 128 lanes; padded classes get zero weights and a -1e30 bias.
    """
    H, O = hidden_size, output_size
    Op = _round_up(max(O, 1), LANE)

    def dense_dir(w_ih, w_hh, b_ih, b_hh):
        wih = jnp.asarray(w_ih, jnp.float32).T          # (E, 4H), blocks i|f|g|o
        whh = jnp.asarray(w_hh, jnp.float32).T          # (H, 4H)
        b = jnp.asarray(b_ih + b_hh, jnp.float32)       # (4H,)
        return wih, whh, b

    wih_f, whh_f, b_f = dense_dir(raw["w_ih_f"], raw["w_hh_f"], raw["b_ih_f"], raw["b_hh_f"])
    wih_b, whh_b, b_b = dense_dir(raw["w_ih_b"], raw["w_hh_b"], raw["b_ih_b"], raw["b_hh_b"])

    wih_all = jnp.concatenate([wih_f, wih_b], axis=1)   # (E, 8H)
    b_all = jnp.concatenate([b_f, b_b])[None, :]        # (1, 8H)

    wl_t = jnp.asarray(raw["w_label"], jnp.float32).T   # (2H, O): rows [h_fwd ; h_bwd]
    wlab_f = jnp.zeros((H, Op), jnp.float32).at[:, :O].set(wl_t[:H, :])
    wlab_b = jnp.zeros((H, Op), jnp.float32).at[:, :O].set(wl_t[H:, :])
    blab = jnp.full((1, Op), NEG_INF, jnp.float32).at[0, :O].set(raw["b_label"])

    return {
        "embedding": jnp.asarray(raw["embedding"], jnp.float32),
        "wih_all": wih_all, "b_all": b_all,
        "whh_f": whh_f, "whh_b": whh_b,
        "wlab_f": wlab_f, "wlab_b": wlab_b, "b_label": blab,
    }


# --------------------------------------------------------------------------- #
# Pure-JAX reference (for correctness check)
# --------------------------------------------------------------------------- #
def _ref_lstm_dir(emb, w_ih, w_hh, b, H):
    dot = functools.partial(jnp.dot, precision=jax.lax.Precision.HIGHEST)
    h = jnp.zeros((H,), jnp.float32)
    c = jnp.zeros((H,), jnp.float32)
    hs = []
    for t in range(emb.shape[0]):
        gates = dot(w_ih, emb[t]) + dot(w_hh, h) + b
        i = jax.nn.sigmoid(gates[0 * H:1 * H])
        f = jax.nn.sigmoid(gates[1 * H:2 * H])
        g = jnp.tanh(gates[2 * H:3 * H])
        o = jax.nn.sigmoid(gates[3 * H:4 * H])
        c = f * c + i * g
        h = o * jnp.tanh(c)
        hs.append(h)
    return jnp.stack(hs)


def reference_forward(sentence, raw, hidden_size):
    H = hidden_size
    emb = raw["embedding"][sentence].astype(jnp.float32)
    hf = _ref_lstm_dir(emb, raw["w_ih_f"], raw["w_hh_f"], raw["b_ih_f"] + raw["b_hh_f"], H)
    hb = _ref_lstm_dir(emb[::-1], raw["w_ih_b"], raw["w_hh_b"],
                       raw["b_ih_b"] + raw["b_hh_b"], H)[::-1]
    feat = jnp.concatenate([hf, hb], axis=1)                     # (T, 2H)
    logits = jnp.dot(feat, raw["w_label"].T,
                     precision=jax.lax.Precision.HIGHEST) + raw["b_label"]
    return jax.nn.log_softmax(logits, axis=1)


# --------------------------------------------------------------------------- #
# Main
# --------------------------------------------------------------------------- #
if __name__ == "__main__":
    hidden_size = 32
    output_size = 2
    vocab_size = 100
    embedding_length = 32
    seq_len = 8

    key = jax.random.PRNGKey(0)
    pkey, skey = jax.random.split(key)
    raw = init_raw_params(pkey, vocab_size, embedding_length, hidden_size, output_size)
    packed = pack_params(raw, hidden_size, output_size)
    sentence = jax.random.randint(skey, (seq_len,), 0, vocab_size, dtype=jnp.int32)

    logprobs = bilstm_forward(sentence, packed, output_size=output_size)
    jax.block_until_ready(logprobs)

    # Correctness checks vs. pure-JAX reference.
    ref = reference_forward(sentence, raw, hidden_size)
    assert logprobs.shape == (seq_len, output_size)
    assert bool(jnp.all(jnp.isfinite(logprobs)))
    assert bool(jnp.allclose(jnp.sum(jnp.exp(logprobs), axis=1), 1.0, atol=1e-5))
    assert bool(jnp.allclose(logprobs, ref, atol=1e-2, rtol=0.0))
    print("KERNEL_OK")
</pallas_src>

<mosaic_0001>
module attributes {stable_mosaic.version = 11 : i64} {
  func.func @_bilstm_kernel(%arg0: memref<8xi32, #tpu.memory_space<smem>>, %arg1: memref<100x32xf32, #tpu.memory_space<vmem>>, %arg2: memref<32x256xf32, #tpu.memory_space<vmem>>, %arg3: memref<1x256xf32, #tpu.memory_space<vmem>>, %arg4: memref<32x128xf32, #tpu.memory_space<vmem>>, %arg5: memref<32x128xf32, #tpu.memory_space<vmem>>, %arg6: memref<32x128xf32, #tpu.memory_space<vmem>>, %arg7: memref<32x128xf32, #tpu.memory_space<vmem>>, %arg8: memref<1x128xf32, #tpu.memory_space<vmem>>, %arg9: memref<8x128xf32, #tpu.memory_space<vmem>>, %arg10: memref<8x32xf32, #tpu.memory_space<vmem>>) attributes {dimension_semantics = [], scalar_prefetch = 0 : i64, scratch_operands = 1 : i64, tpu.core_type = #tpu.core_type<tc>} {
    %c0 = arith.constant 0 : index
    %0 = memref.load %arg0[%c0] : memref<8xi32, #tpu.memory_space<smem>>
    %1 = arith.index_cast %0 : i32 to index
    %c0_0 = arith.constant 0 : index
    %2 = vector.load %arg1[%1, %c0_0] : memref<100x32xf32, #tpu.memory_space<vmem>>, vector<1x32xf32>
    %c0_1 = arith.constant 0 : index
    %c0_2 = arith.constant 0 : index
    %3 = vector.load %arg10[%c0_1, %c0_2] : memref<8x32xf32, #tpu.memory_space<vmem>>, vector<1x32xf32>
    tpu.vector_store %arg10[%c0_1, %c0_2], %2 {strides = array<i32>} : memref<8x32xf32, #tpu.memory_space<vmem>>, vector<1x32xf32>,
    %c1 = arith.constant 1 : index
    %4 = memref.load %arg0[%c1] : memref<8xi32, #tpu.memory_space<smem>>
    %5 = arith.index_cast %4 : i32 to index
    %c0_3 = arith.constant 0 : index
    %6 = vector.load %arg1[%5, %c0_3] : memref<100x32xf32, #tpu.memory_space<vmem>>, vector<1x32xf32>
    %c1_4 = arith.constant 1 : index
    %c0_5 = arith.constant 0 : index
    %7 = vector.load %arg10[%c1_4, %c0_5] : memref<8x32xf32, #tpu.memory_space<vmem>>, vector<1x32xf32>
    tpu.vector_store %arg10[%c1_4, %c0_5], %6 {strides = array<i32>} : memref<8x32xf32, #tpu.memory_space<vmem>>, vector<1x32xf32>,
    %c2 = arith.constant 2 : index
    %8 = memref.load %arg0[%c2] : memref<8xi32, #tpu.memory_space<smem>>
    %9 = arith.index_cast %8 : i32 to index
    %c0_6 = arith.constant 0 : index
    %10 = vector.load %arg1[%9, %c0_6] : memref<100x32xf32, #tpu.memory_space<vmem>>, vector<1x32xf32>
    %c2_7 = arith.constant 2 : index
    %c0_8 = arith.constant 0 : index
    %11 = vector.load %arg10[%c2_7, %c0_8] : memref<8x32xf32, #tpu.memory_space<vmem>>, vector<1x32xf32>
    tpu.vector_store %arg10[%c2_7, %c0_8], %10 {strides = array<i32>} : memref<8x32xf32, #tpu.memory_space<vmem>>, vector<1x32xf32>,
    %c3 = arith.constant 3 : index
    %12 = memref.load %arg0[%c3] : memref<8xi32, #tpu.memory_space<smem>>
    %13 = arith.index_cast %12 : i32 to index
    %c0_9 = arith.constant 0 : index
    %14 = vector.load %arg1[%13, %c0_9] : memref<100x32xf32, #tpu.memory_space<vmem>>, vector<1x32xf32>
    %c3_10 = arith.constant 3 : index
    %c0_11 = arith.constant 0 : index
    %15 = vector.load %arg10[%c3_10, %c0_11] : memref<8x32xf32, #tpu.memory_space<vmem>>, vector<1x32xf32>
    tpu.vector_store %arg10[%c3_10, %c0_11], %14 {strides = array<i32>} : memref<8x32xf32, #tpu.memory_space<vmem>>, vector<1x32xf32>,
    %c4 = arith.constant 4 : index
    %16 = memref.load %arg0[%c4] : memref<8xi32, #tpu.memory_space<smem>>
    %17 = arith.index_cast %16 : i32 to index
    %c0_12 = arith.constant 0 : index
    %18 = vector.load %arg1[%17, %c0_12] : memref<100x32xf32, #tpu.memory_space<vmem>>, vector<1x32xf32>
    %c4_13 = arith.constant 4 : index
    %c0_14 = arith.constant 0 : index
    %19 = vector.load %arg10[%c4_13, %c0_14] : memref<8x32xf32, #tpu.memory_space<vmem>>, vector<1x32xf32>
    tpu.vector_store %arg10[%c4_13, %c0_14], %18 {strides = array<i32>} : memref<8x32xf32, #tpu.memory_space<vmem>>, vector<1x32xf32>,
    %c5 = arith.constant 5 : index
    %20 = memref.load %arg0[%c5] : memref<8xi32, #tpu.memory_space<smem>>
    %21 = arith.index_cast %20 : i32 to index
    %c0_15 = arith.constant 0 : index
    %22 = vector.load %arg1[%21, %c0_15] : memref<100x32xf32, #tpu.memory_space<vmem>>, vector<1x32xf32>
    %c5_16 = arith.constant 5 : index
    %c0_17 = arith.constant 0 : index
    %23 = vector.load %arg10[%c5_16, %c0_17] : memref<8x32xf32, #tpu.memory_space<vmem>>, vector<1x32xf32>
    tpu.vector_store %arg10[%c5_16, %c0_17], %22 {strides = array<i32>} : memref<8x32xf32, #tpu.memory_space<vmem>>, vector<1x32xf32>,
    %c6 = arith.constant 6 : index
    %24 = memref.load %arg0[%c6] : memref<8xi32, #tpu.memory_space<smem>>
    %25 = arith.index_cast %24 : i32 to index
    %c0_18 = arith.constant 0 : index
    %26 = vector.load %arg1[%25, %c0_18] : memref<100x32xf32, #tpu.memory_space<vmem>>, vector<1x32xf32>
    %c6_19 = arith.constant 6 : index
    %c0_20 = arith.constant 0 : index
    %27 = vector.load %arg10[%c6_19, %c0_20] : memref<8x32xf32, #tpu.memory_space<vmem>>, vector<1x32xf32>
    tpu.vector_store %arg10[%c6_19, %c0_20], %26 {strides = array<i32>} : memref<8x32xf32, #tpu.memory_space<vmem>>, vector<1x32xf32>,
    %c7 = arith.constant 7 : index
    %28 = memref.load %arg0[%c7] : memref<8xi32, #tpu.memory_space<smem>>
    %29 = arith.index_cast %28 : i32 to index
    %c0_21 = arith.constant 0 : index
    %30 = vector.load %arg1[%29, %c0_21] : memref<100x32xf32, #tpu.memory_space<vmem>>, vector<1x32xf32>
    %c7_22 = arith.constant 7 : index
    %c0_23 = arith.constant 0 : index
    %31 = vector.load %arg10[%c7_22, %c0_23] : memref<8x32xf32, #tpu.memory_space<vmem>>, vector<1x32xf32>
    tpu.vector_store %arg10[%c7_22, %c0_23], %30 {strides = array<i32>} : memref<8x32xf32, #tpu.memory_space<vmem>>, vector<1x32xf32>,
    %c0_24 = arith.constant 0 : index
    %c0_25 = arith.constant 0 : index
    %32 = vector.load %arg10[%c0_24, %c0_25] : memref<8x32xf32, #tpu.memory_space<vmem>>, vector<8x32xf32>
    %c0_26 = arith.constant 0 : index
    %c0_27 = arith.constant 0 : index
    %33 = vector.load %arg2[%c0_26, %c0_27] : memref<32x256xf32, #tpu.memory_space<vmem>>, vector<32x256xf32>
    %cst = arith.constant dense<0.000000e+00> : vector<8x256xf32>
    %34 = tpu.matmul %32, %33, %cst {dimension_numbers = #tpu.dot_dimension_numbers<[1], [0], [0], [1], [0, 0, 1, 1], [], []>} : vector<8x32xf32>, vector<32x256xf32>, vector<8x256xf32> -> vector<8x256xf32>
    %c0_28 = arith.constant 0 : index
    %c0_29 = arith.constant 0 : index
    %35 = vector.load %arg3[%c0_28, %c0_29] : memref<1x256xf32, #tpu.memory_space<vmem>>, vector<1x256xf32>
    %36 = vector.broadcast %35 : vector<1x256xf32> to vector<8x256xf32>
    %37 = arith.addf %34, %36 : vector<8x256xf32>
    %38 = vector.extract_strided_slice %37 {offsets = [0, 0], sizes = [8, 128], strides = [1, 1]} : vector<8x256xf32> to vector<8x128xf32>
    %39 = vector.extract_strided_slice %37 {offsets = [0, 128], sizes = [8, 128], strides = [1, 1]} : vector<8x256xf32> to vector<8x128xf32>
    %c0_30 = arith.constant 0 : index
    %c0_31 = arith.constant 0 : index
    %40 = vector.load %arg4[%c0_30, %c0_31] : memref<32x128xf32, #tpu.memory_space<vmem>>, vector<32x128xf32>
    %c0_32 = arith.constant 0 : index
    %c0_33 = arith.constant 0 : index
    %41 = vector.load %arg5[%c0_32, %c0_33] : memref<32x128xf32, #tpu.memory_space<vmem>>, vector<32x128xf32>
    %cst_34 = arith.constant 0.000000e+00 : f32
    %42 = vector.broadcast %cst_34 : f32 to vector<1x32xf32>
    %43 = vector.extract_strided_slice %38 {offsets = [0, 0], sizes = [1, 128], strides = [1, 1]} : vector<8x128xf32> to vector<1x128xf32>
    %cst_35 = arith.constant dense<0.000000e+00> : vector<1x128xf32>
    %44 = tpu.matmul %42, %40, %cst_35 {dimension_numbers = #tpu.dot_dimension_numbers<[1], [0], [0], [1], [0, 0, 1, 1], [], []>} : vector<1x32xf32>, vector<32x128xf32>, vector<1x128xf32> -> vector<1x128xf32>
    %45 = arith.addf %43, %44 : vector<1x128xf32>
    %46 = vector.extract_strided_slice %39 {offsets = [7, 0], sizes = [1, 128], strides = [1, 1]} : vector<8x128xf32> to vector<1x128xf32>
    %cst_36 = arith.constant dense<0.000000e+00> : vector<1x128xf32>
    %47 = tpu.matmul %42, %41, %cst_36 {dimension_numbers = #tpu.dot_dimension_numbers<[1], [0], [0], [1], [0, 0, 1, 1], [], []>} : vector<1x32xf32>, vector<32x128xf32>, vector<1x128xf32> -> vector<1x128xf32>
    %48 = arith.addf %46, %47 : vector<1x128xf32>
    %49 = arith.negf %45 : vector<1x128xf32>
    %50 = math.exp %49 : vector<1x128xf32>
    %cst_37 = arith.constant 1.000000e+00 : f32
    %51 = vector.broadcast %cst_37 : f32 to vector<1x128xf32>
    %52 = arith.addf %51, %50 : vector<1x128xf32>
    %53 = arith.divf %51, %52 : vector<1x128xf32>
    %54 = math.tanh %45 : vector<1x128xf32>
    %55 = vector.extract_strided_slice %53 {offsets = [0, 0], sizes = [1, 32], strides = [1, 1]} : vector<1x128xf32> to vector<1x32xf32>
    %56 = vector.extract_strided_slice %53 {offsets = [0, 32], sizes = [1, 32], strides = [1, 1]} : vector<1x128xf32> to vector<1x32xf32>
    %57 = vector.extract_strided_slice %54 {offsets = [0, 64], sizes = [1, 32], strides = [1, 1]} : vector<1x128xf32> to vector<1x32xf32>
    %58 = vector.extract_strided_slice %53 {offsets = [0, 96], sizes = [1, 32], strides = [1, 1]} : vector<1x128xf32> to vector<1x32xf32>
    %59 = arith.mulf %56, %42 : vector<1x32xf32>
    %60 = arith.mulf %55, %57 : vector<1x32xf32>
    %61 = arith.addf %59, %60 : vector<1x32xf32>
    %62 = math.tanh %61 : vector<1x32xf32>
    %63 = arith.mulf %58, %62 : vector<1x32xf32>
    %64 = arith.negf %48 : vector<1x128xf32>
    %65 = math.exp %64 : vector<1x128xf32>
    %cst_38 = arith.constant 1.000000e+00 : f32
    %66 = vector.broadcast %cst_38 : f32 to vector<1x128xf32>
    %67 = arith.addf %66, %65 : vector<1x128xf32>
    %68 = arith.divf %66, %67 : vector<1x128xf32>
    %69 = math.tanh %48 : vector<1x128xf32>
    %70 = vector.extract_strided_slice %68 {offsets = [0, 0], sizes = [1, 32], strides = [1, 1]} : vector<1x128xf32> to vector<1x32xf32>
    %71 = vector.extract_strided_slice %68 {offsets = [0, 32], sizes = [1, 32], strides = [1, 1]} : vector<1x128xf32> to vector<1x32xf32>
    %72 = vector.extract_strided_slice %69 {offsets = [0, 64], sizes = [1, 32], strides = [1, 1]} : vector<1x128xf32> to vector<1x32xf32>
    %73 = vector.extract_strided_slice %68 {offsets = [0, 96], sizes = [1, 32], strides = [1, 1]} : vector<1x128xf32> to vector<1x32xf32>
    %74 = arith.mulf %71, %42 : vector<1x32xf32>
    %75 = arith.mulf %70, %72 : vector<1x32xf32>
    %76 = arith.addf %74, %75 : vector<1x32xf32>
    %77 = math.tanh %76 : vector<1x32xf32>
    %78 = arith.mulf %73, %77 : vector<1x32xf32>
    %79 = vector.extract_strided_slice %38 {offsets = [1, 0], sizes = [1, 128], strides = [1, 1]} : vector<8x128xf32> to vector<1x128xf32>
    %cst_39 = arith.constant dense<0.000000e+00> : vector<1x128xf32>
    %80 = tpu.matmul %63, %40, %cst_39 {dimension_numbers = #tpu.dot_dimension_numbers<[1], [0], [0], [1], [0, 0, 1, 1], [], []>} : vector<1x32xf32>, vector<32x128xf32>, vector<1x128xf32> -> vector<1x128xf32>
    %81 = arith.addf %79, %80 : vector<1x128xf32>
    %82 = vector.extract_strided_slice %39 {offsets = [6, 0], sizes = [1, 128], strides = [1, 1]} : vector<8x128xf32> to vector<1x128xf32>
    %cst_40 = arith.constant dense<0.000000e+00> : vector<1x128xf32>
    %83 = tpu.matmul %78, %41, %cst_40 {dimension_numbers = #tpu.dot_dimension_numbers<[1], [0], [0], [1], [0, 0, 1, 1], [], []>} : vector<1x32xf32>, vector<32x128xf32>, vector<1x128xf32> -> vector<1x128xf32>
    %84 = arith.addf %82, %83 : vector<1x128xf32>
    %85 = arith.negf %81 : vector<1x128xf32>
    %86 = math.exp %85 : vector<1x128xf32>
    %cst_41 = arith.constant 1.000000e+00 : f32
    %87 = vector.broadcast %cst_41 : f32 to vector<1x128xf32>
    %88 = arith.addf %87, %86 : vector<1x128xf32>
    %89 = arith.divf %87, %88 : vector<1x128xf32>
    %90 = math.tanh %81 : vector<1x128xf32>
    %91 = vector.extract_strided_slice %89 {offsets = [0, 0], sizes = [1, 32], strides = [1, 1]} : vector<1x128xf32> to vector<1x32xf32>
    %92 = vector.extract_strided_slice %89 {offsets = [0, 32], sizes = [1, 32], strides = [1, 1]} : vector<1x128xf32> to vector<1x32xf32>
    %93 = vector.extract_strided_slice %90 {offsets = [0, 64], sizes = [1, 32], strides = [1, 1]} : vector<1x128xf32> to vector<1x32xf32>
    %94 = vector.extract_strided_slice %89 {offsets = [0, 96], sizes = [1, 32], strides = [1, 1]} : vector<1x128xf32> to vector<1x32xf32>
    %95 = arith.mulf %92, %61 : vector<1x32xf32>
    %96 = arith.mulf %91, %93 : vector<1x32xf32>
    %97 = arith.addf %95, %96 : vector<1x32xf32>
    %98 = math.tanh %97 : vector<1x32xf32>
    %99 = arith.mulf %94, %98 : vector<1x32xf32>
    %100 = arith.negf %84 : vector<1x128xf32>
    %101 = math.exp %100 : vector<1x128xf32>
    %cst_42 = arith.constant 1.000000e+00 : f32
    %102 = vector.broadcast %cst_42 : f32 to vector<1x128xf32>
    %103 = arith.addf %102, %101 : vector<1x128xf32>
    %104 = arith.divf %102, %103 : vector<1x128xf32>
    %105 = math.tanh %84 : vector<1x128xf32>
    %106 = vector.extract_strided_slice %104 {offsets = [0, 0], sizes = [1, 32], strides = [1, 1]} : vector<1x128xf32> to vector<1x32xf32>
    %107 = vector.extract_strided_slice %104 {offsets = [0, 32], sizes = [1, 32], strides = [1, 1]} : vector<1x128xf32> to vector<1x32xf32>
    %108 = vector.extract_strided_slice %105 {offsets = [0, 64], sizes = [1, 32], strides = [1, 1]} : vector<1x128xf32> to vector<1x32xf32>
    %109 = vector.extract_strided_slice %104 {offsets = [0, 96], sizes = [1, 32], strides = [1, 1]} : vector<1x128xf32> to vector<1x32xf32>
    %110 = arith.mulf %107, %76 : vector<1x32xf32>
    %111 = arith.mulf %106, %108 : vector<1x32xf32>
    %112 = arith.addf %110, %111 : vector<1x32xf32>
    %113 = math.tanh %112 : vector<1x32xf32>
    %114 = arith.mulf %109, %113 : vector<1x32xf32>
    %115 = vector.extract_strided_slice %38 {offsets = [2, 0], sizes = [1, 128], strides = [1, 1]} : vector<8x128xf32> to vector<1x128xf32>
    %cst_43 = arith.constant dense<0.000000e+00> : vector<1x128xf32>
    %116 = tpu.matmul %99, %40, %cst_43 {dimension_numbers = #tpu.dot_dimension_numbers<[1], [0], [0], [1], [0, 0, 1, 1], [], []>} : vector<1x32xf32>, vector<32x128xf32>, vector<1x128xf32> -> vector<1x128xf32>
    %117 = arith.addf %115, %116 : vector<1x128xf32>
    %118 = vector.extract_strided_slice %39 {offsets = [5, 0], sizes = [1, 128], strides = [1, 1]} : vector<8x128xf32> to vector<1x128xf32>
    %cst_44 = arith.constant dense<0.000000e+00> : vector<1x128xf32>
    %119 = tpu.matmul %114, %41, %cst_44 {dimension_numbers = #tpu.dot_dimension_numbers<[1], [0], [0], [1], [0, 0, 1, 1], [], []>} : vector<1x32xf32>, vector<32x128xf32>, vector<1x128xf32> -> vector<1x128xf32>
    %120 = arith.addf %118, %119 : vector<1x128xf32>
    %121 = arith.negf %117 : vector<1x128xf32>
    %122 = math.exp %121 : vector<1x128xf32>
    %cst_45 = arith.constant 1.000000e+00 : f32
    %123 = vector.broadcast %cst_45 : f32 to vector<1x128xf32>
    %124 = arith.addf %123, %122 : vector<1x128xf32>
    %125 = arith.divf %123, %124 : vector<1x128xf32>
    %126 = math.tanh %117 : vector<1x128xf32>
    %127 = vector.extract_strided_slice %125 {offsets = [0, 0], sizes = [1, 32], strides = [1, 1]} : vector<1x128xf32> to vector<1x32xf32>
    %128 = vector.extract_strided_slice %125 {offsets = [0, 32], sizes = [1, 32], strides = [1, 1]} : vector<1x128xf32> to vector<1x32xf32>
    %129 = vector.extract_strided_slice %126 {offsets = [0, 64], sizes = [1, 32], strides = [1, 1]} : vector<1x128xf32> to vector<1x32xf32>
    %130 = vector.extract_strided_slice %125 {offsets = [0, 96], sizes = [1, 32], strides = [1, 1]} : vector<1x128xf32> to vector<1x32xf32>
    %131 = arith.mulf %128, %97 : vector<1x32xf32>
    %132 = arith.mulf %127, %129 : vector<1x32xf32>
    %133 = arith.addf %131, %132 : vector<1x32xf32>
    %134 = math.tanh %133 : vector<1x32xf32>
    %135 = arith.mulf %130, %134 : vector<1x32xf32>
    %136 = arith.negf %120 : vector<1x128xf32>
    %137 = math.exp %136 : vector<1x128xf32>
    %cst_46 = arith.constant 1.000000e+00 : f32
    %138 = vector.broadcast %cst_46 : f32 to vector<1x128xf32>
    %139 = arith.addf %138, %137 : vector<1x128xf32>
    %140 = arith.divf %138, %139 : vector<1x128xf32>
    %141 = math.tanh %120 : vector<1x128xf32>
    %142 = vector.extract_strided_slice %140 {offsets = [0, 0], sizes = [1, 32], strides = [1, 1]} : vector<1x128xf32> to vector<1x32xf32>
    %143 = vector.extract_strided_slice %140 {offsets = [0, 32], sizes = [1, 32], strides = [1, 1]} : vector<1x128xf32> to vector<1x32xf32>
    %144 = vector.extract_strided_slice %141 {offsets = [0, 64], sizes = [1, 32], strides = [1, 1]} : vector<1x128xf32> to vector<1x32xf32>
    %145 = vector.extract_strided_slice %140 {offsets = [0, 96], sizes = [1, 32], strides = [1, 1]} : vector<1x128xf32> to vector<1x32xf32>
    %146 = arith.mulf %143, %112 : vector<1x32xf32>
    %147 = arith.mulf %142, %144 : vector<1x32xf32>
    %148 = arith.addf %146, %147 : vector<1x32xf32>
    %149 = math.tanh %148 : vector<1x32xf32>
    %150 = arith.mulf %145, %149 : vector<1x32xf32>
    %151 = vector.extract_strided_slice %38 {offsets = [3, 0], sizes = [1, 128], strides = [1, 1]} : vector<8x128xf32> to vector<1x128xf32>
    %cst_47 = arith.constant dense<0.000000e+00> : vector<1x128xf32>
    %152 = tpu.matmul %135, %40, %cst_47 {dimension_numbers = #tpu.dot_dimension_numbers<[1], [0], [0], [1], [0, 0, 1, 1], [], []>} : vector<1x32xf32>, vector<32x128xf32>, vector<1x128xf32> -> vector<1x128xf32>
    %153 = arith.addf %151, %152 : vector<1x128xf32>
    %154 = vector.extract_strided_slice %39 {offsets = [4, 0], sizes = [1, 128], strides = [1, 1]} : vector<8x128xf32> to vector<1x128xf32>
    %cst_48 = arith.constant dense<0.000000e+00> : vector<1x128xf32>
    %155 = tpu.matmul %150, %41, %cst_48 {dimension_numbers = #tpu.dot_dimension_numbers<[1], [0], [0], [1], [0, 0, 1, 1], [], []>} : vector<1x32xf32>, vector<32x128xf32>, vector<1x128xf32> -> vector<1x128xf32>
    %156 = arith.addf %154, %155 : vector<1x128xf32>
    %157 = arith.negf %153 : vector<1x128xf32>
    %158 = math.exp %157 : vector<1x128xf32>
    %cst_49 = arith.constant 1.000000e+00 : f32
    %159 = vector.broadcast %cst_49 : f32 to vector<1x128xf32>
    %160 = arith.addf %159, %158 : vector<1x128xf32>
    %161 = arith.divf %159, %160 : vector<1x128xf32>
    %162 = math.tanh %153 : vector<1x128xf32>
    %163 = vector.extract_strided_slice %161 {offsets = [0, 0], sizes = [1, 32], strides = [1, 1]} : vector<1x128xf32> to vector<1x32xf32>
    %164 = vector.extract_strided_slice %161 {offsets = [0, 32], sizes = [1, 32], strides = [1, 1]} : vector<1x128xf32> to vector<1x32xf32>
    %165 = vector.extract_strided_slice %162 {offsets = [0, 64], sizes = [1, 32], strides = [1, 1]} : vector<1x128xf32> to vector<1x32xf32>
    %166 = vector.extract_strided_slice %161 {offsets = [0, 96], sizes = [1, 32], strides = [1, 1]} : vector<1x128xf32> to vector<1x32xf32>
    %167 = arith.mulf %164, %133 : vector<1x32xf32>
    %168 = arith.mulf %163, %165 : vector<1x32xf32>
    %169 = arith.addf %167, %168 : vector<1x32xf32>
    %170 = math.tanh %169 : vector<1x32xf32>
    %171 = arith.mulf %166, %170 : vector<1x32xf32>
    %172 = arith.negf %156 : vector<1x128xf32>
    %173 = math.exp %172 : vector<1x128xf32>
    %cst_50 = arith.constant 1.000000e+00 : f32
    %174 = vector.broadcast %cst_50 : f32 to vector<1x128xf32>
    %175 = arith.addf %174, %173 : vector<1x128xf32>
    %176 = arith.divf %174, %175 : vector<1x128xf32>
    %177 = math.tanh %156 : vector<1x128xf32>
    %178 = vector.extract_strided_slice %176 {offsets = [0, 0], sizes = [1, 32], strides = [1, 1]} : vector<1x128xf32> to vector<1x32xf32>
    %179 = vector.extract_strided_slice %176 {offsets = [0, 32], sizes = [1, 32], strides = [1, 1]} : vector<1x128xf32> to vector<1x32xf32>
    %180 = vector.extract_strided_slice %177 {offsets = [0, 64], sizes = [1, 32], strides = [1, 1]} : vector<1x128xf32> to vector<1x32xf32>
    %181 = vector.extract_strided_slice %176 {offsets = [0, 96], sizes = [1, 32], strides = [1, 1]} : vector<1x128xf32> to vector<1x32xf32>
    %182 = arith.mulf %179, %148 : vector<1x32xf32>
    %183 = arith.mulf %178, %180 : vector<1x32xf32>
    %184 = arith.addf %182, %183 : vector<1x32xf32>
    %185 = math.tanh %184 : vector<1x32xf32>
    %186 = arith.mulf %181, %185 : vector<1x32xf32>
    %187 = vector.extract_strided_slice %38 {offsets = [4, 0], sizes = [1, 128], strides = [1, 1]} : vector<8x128xf32> to vector<1x128xf32>
    %cst_51 = arith.constant dense<0.000000e+00> : vector<1x128xf32>
    %188 = tpu.matmul %171, %40, %cst_51 {dimension_numbers = #tpu.dot_dimension_numbers<[1], [0], [0], [1], [0, 0, 1, 1], [], []>} : vector<1x32xf32>, vector<32x128xf32>, vector<1x128xf32> -> vector<1x128xf32>
    %189 = arith.addf %187, %188 : vector<1x128xf32>
    %190 = vector.extract_strided_slice %39 {offsets = [3, 0], sizes = [1, 128], strides = [1, 1]} : vector<8x128xf32> to vector<1x128xf32>
    %cst_52 = arith.constant dense<0.000000e+00> : vector<1x128xf32>
    %191 = tpu.matmul %186, %41, %cst_52 {dimension_numbers = #tpu.dot_dimension_numbers<[1], [0], [0], [1], [0, 0, 1, 1], [], []>} : vector<1x32xf32>, vector<32x128xf32>, vector<1x128xf32> -> vector<1x128xf32>
    %192 = arith.addf %190, %191 : vector<1x128xf32>
    %193 = arith.negf %189 : vector<1x128xf32>
    %194 = math.exp %193 : vector<1x128xf32>
    %cst_53 = arith.constant 1.000000e+00 : f32
    %195 = vector.broadcast %cst_53 : f32 to vector<1x128xf32>
    %196 = arith.addf %195, %194 : vector<1x128xf32>
    %197 = arith.divf %195, %196 : vector<1x128xf32>
    %198 = math.tanh %189 : vector<1x128xf32>
    %199 = vector.extract_strided_slice %197 {offsets = [0, 0], sizes = [1, 32], strides = [1, 1]} : vector<1x128xf32> to vector<1x32xf32>
    %200 = vector.extract_strided_slice %197 {offsets = [0, 32], sizes = [1, 32], strides = [1, 1]} : vector<1x128xf32> to vector<1x32xf32>
    %201 = vector.extract_strided_slice %198 {offsets = [0, 64], sizes = [1, 32], strides = [1, 1]} : vector<1x128xf32> to vector<1x32xf32>
    %202 = vector.extract_strided_slice %197 {offsets = [0, 96], sizes = [1, 32], strides = [1, 1]} : vector<1x128xf32> to vector<1x32xf32>
    %203 = arith.mulf %200, %169 : vector<1x32xf32>
    %204 = arith.mulf %199, %201 : vector<1x32xf32>
    %205 = arith.addf %203, %204 : vector<1x32xf32>
    %206 = math.tanh %205 : vector<1x32xf32>
    %207 = arith.mulf %202, %206 : vector<1x32xf32>
    %208 = arith.negf %192 : vector<1x128xf32>
    %209 = math.exp %208 : vector<1x128xf32>
    %cst_54 = arith.constant 1.000000e+00 : f32
    %210 = vector.broadcast %cst_54 : f32 to vector<1x128xf32>
    %211 = arith.addf %210, %209 : vector<1x128xf32>
    %212 = arith.divf %210, %211 : vector<1x128xf32>
    %213 = math.tanh %192 : vector<1x128xf32>
    %214 = vector.extract_strided_slice %212 {offsets = [0, 0], sizes = [1, 32], strides = [1, 1]} : vector<1x128xf32> to vector<1x32xf32>
    %215 = vector.extract_strided_slice %212 {offsets = [0, 32], sizes = [1, 32], strides = [1, 1]} : vector<1x128xf32> to vector<1x32xf32>
    %216 = vector.extract_strided_slice %213 {offsets = [0, 64], sizes = [1, 32], strides = [1, 1]} : vector<1x128xf32> to vector<1x32xf32>
    %217 = vector.extract_strided_slice %212 {offsets = [0, 96], sizes = [1, 32], strides = [1, 1]} : vector<1x128xf32> to vector<1x32xf32>
    %218 = arith.mulf %215, %184 : vector<1x32xf32>
    %219 = arith.mulf %214, %216 : vector<1x32xf32>
    %220 = arith.addf %218, %219 : vector<1x32xf32>
    %221 = math.tanh %220 : vector<1x32xf32>
    %222 = arith.mulf %217, %221 : vector<1x32xf32>
    %223 = vector.extract_strided_slice %38 {offsets = [5, 0], sizes = [1, 128], strides = [1, 1]} : vector<8x128xf32> to vector<1x128xf32>
    %cst_55 = arith.constant dense<0.000000e+00> : vector<1x128xf32>
    %224 = tpu.matmul %207, %40, %cst_55 {dimension_numbers = #tpu.dot_dimension_numbers<[1], [0], [0], [1], [0, 0, 1, 1], [], []>} : vector<1x32xf32>, vector<32x128xf32>, vector<1x128xf32> -> vector<1x128xf32>
    %225 = arith.addf %223, %224 : vector<1x128xf32>
    %226 = vector.extract_strided_slice %39 {offsets = [2, 0], sizes = [1, 128], strides = [1, 1]} : vector<8x128xf32> to vector<1x128xf32>
    %cst_56 = arith.constant dense<0.000000e+00> : vector<1x128xf32>
    %227 = tpu.matmul %222, %41, %cst_56 {dimension_numbers = #tpu.dot_dimension_numbers<[1], [0], [0], [1], [0, 0, 1, 1], [], []>} : vector<1x32xf32>, vector<32x128xf32>, vector<1x128xf32> -> vector<1x128xf32>
    %228 = arith.addf %226, %227 : vector<1x128xf32>
    %229 = arith.negf %225 : vector<1x128xf32>
    %230 = math.exp %229 : vector<1x128xf32>
    %cst_57 = arith.constant 1.000000e+00 : f32
    %231 = vector.broadcast %cst_57 : f32 to vector<1x128xf32>
    %232 = arith.addf %231, %230 : vector<1x128xf32>
    %233 = arith.divf %231, %232 : vector<1x128xf32>
    %234 = math.tanh %225 : vector<1x128xf32>
    %235 = vector.extract_strided_slice %233 {offsets = [0, 0], sizes = [1, 32], strides = [1, 1]} : vector<1x128xf32> to vector<1x32xf32>
    %236 = vector.extract_strided_slice %233 {offsets = [0, 32], sizes = [1, 32], strides = [1, 1]} : vector<1x128xf32> to vector<1x32xf32>
    %237 = vector.extract_strided_slice %234 {offsets = [0, 64], sizes = [1, 32], strides = [1, 1]} : vector<1x128xf32> to vector<1x32xf32>
    %238 = vector.extract_strided_slice %233 {offsets = [0, 96], sizes = [1, 32], strides = [1, 1]} : vector<1x128xf32> to vector<1x32xf32>
    %239 = arith.mulf %236, %205 : vector<1x32xf32>
    %240 = arith.mulf %235, %237 : vector<1x32xf32>
    %241 = arith.addf %239, %240 : vector<1x32xf32>
    %242 = math.tanh %241 : vector<1x32xf32>
    %243 = arith.mulf %238, %242 : vector<1x32xf32>
    %244 = arith.negf %228 : vector<1x128xf32>
    %245 = math.exp %244 : vector<1x128xf32>
    %cst_58 = arith.constant 1.000000e+00 : f32
    %246 = vector.broadcast %cst_58 : f32 to vector<1x128xf32>
    %247 = arith.addf %246, %245 : vector<1x128xf32>
    %248 = arith.divf %246, %247 : vector<1x128xf32>
    %249 = math.tanh %228 : vector<1x128xf32>
    %250 = vector.extract_strided_slice %248 {offsets = [0, 0], sizes = [1, 32], strides = [1, 1]} : vector<1x128xf32> to vector<1x32xf32>
    %251 = vector.extract_strided_slice %248 {offsets = [0, 32], sizes = [1, 32], strides = [1, 1]} : vector<1x128xf32> to vector<1x32xf32>
    %252 = vector.extract_strided_slice %249 {offsets = [0, 64], sizes = [1, 32], strides = [1, 1]} : vector<1x128xf32> to vector<1x32xf32>
    %253 = vector.extract_strided_slice %248 {offsets = [0, 96], sizes = [1, 32], strides = [1, 1]} : vector<1x128xf32> to vector<1x32xf32>
    %254 = arith.mulf %251, %220 : vector<1x32xf32>
    %255 = arith.mulf %250, %252 : vector<1x32xf32>
    %256 = arith.addf %254, %255 : vector<1x32xf32>
    %257 = math.tanh %256 : vector<1x32xf32>
    %258 = arith.mulf %253, %257 : vector<1x32xf32>
    %259 = vector.extract_strided_slice %38 {offsets = [6, 0], sizes = [1, 128], strides = [1, 1]} : vector<8x128xf32> to vector<1x128xf32>
    %cst_59 = arith.constant dense<0.000000e+00> : vector<1x128xf32>
    %260 = tpu.matmul %243, %40, %cst_59 {dimension_numbers = #tpu.dot_dimension_numbers<[1], [0], [0], [1], [0, 0, 1, 1], [], []>} : vector<1x32xf32>, vector<32x128xf32>, vector<1x128xf32> -> vector<1x128xf32>
    %261 = arith.addf %259, %260 : vector<1x128xf32>
    %262 = vector.extract_strided_slice %39 {offsets = [1, 0], sizes = [1, 128], strides = [1, 1]} : vector<8x128xf32> to vector<1x128xf32>
    %cst_60 = arith.constant dense<0.000000e+00> : vector<1x128xf32>
    %263 = tpu.matmul %258, %41, %cst_60 {dimension_numbers = #tpu.dot_dimension_numbers<[1], [0], [0], [1], [0, 0, 1, 1], [], []>} : vector<1x32xf32>, vector<32x128xf32>, vector<1x128xf32> -> vector<1x128xf32>
    %264 = arith.addf %262, %263 : vector<1x128xf32>
    %265 = arith.negf %261 : vector<1x128xf32>
    %266 = math.exp %265 : vector<1x128xf32>
    %cst_61 = arith.constant 1.000000e+00 : f32
    %267 = vector.broadcast %cst_61 : f32 to vector<1x128xf32>
    %268 = arith.addf %267, %266 : vector<1x128xf32>
    %269 = arith.divf %267, %268 : vector<1x128xf32>
    %270 = math.tanh %261 : vector<1x128xf32>
    %271 = vector.extract_strided_slice %269 {offsets = [0, 0], sizes = [1, 32], strides = [1, 1]} : vector<1x128xf32> to vector<1x32xf32>
    %272 = vector.extract_strided_slice %269 {offsets = [0, 32], sizes = [1, 32], strides = [1, 1]} : vector<1x128xf32> to vector<1x32xf32>
    %273 = vector.extract_strided_slice %270 {offsets = [0, 64], sizes = [1, 32], strides = [1, 1]} : vector<1x128xf32> to vector<1x32xf32>
    %274 = vector.extract_strided_slice %269 {offsets = [0, 96], sizes = [1, 32], strides = [1, 1]} : vector<1x128xf32> to vector<1x32xf32>
    %275 = arith.mulf %272, %241 : vector<1x32xf32>
    %276 = arith.mulf %271, %273 : vector<1x32xf32>
    %277 = arith.addf %275, %276 : vector<1x32xf32>
    %278 = math.tanh %277 : vector<1x32xf32>
    %279 = arith.mulf %274, %278 : vector<1x32xf32>
    %280 = arith.negf %264 : vector<1x128xf32>
    %281 = math.exp %280 : vector<1x128xf32>
    %cst_62 = arith.constant 1.000000e+00 : f32
    %282 = vector.broadcast %cst_62 : f32 to vector<1x128xf32>
    %283 = arith.addf %282, %281 : vector<1x128xf32>
    %284 = arith.divf %282, %283 : vector<1x128xf32>
    %285 = math.tanh %264 : vector<1x128xf32>
    %286 = vector.extract_strided_slice %284 {offsets = [0, 0], sizes = [1, 32], strides = [1, 1]} : vector<1x128xf32> to vector<1x32xf32>
    %287 = vector.extract_strided_slice %284 {offsets = [0, 32], sizes = [1, 32], strides = [1, 1]} : vector<1x128xf32> to vector<1x32xf32>
    %288 = vector.extract_strided_slice %285 {offsets = [0, 64], sizes = [1, 32], strides = [1, 1]} : vector<1x128xf32> to vector<1x32xf32>
    %289 = vector.extract_strided_slice %284 {offsets = [0, 96], sizes = [1, 32], strides = [1, 1]} : vector<1x128xf32> to vector<1x32xf32>
    %290 = arith.mulf %287, %256 : vector<1x32xf32>
    %291 = arith.mulf %286, %288 : vector<1x32xf32>
    %292 = arith.addf %290, %291 : vector<1x32xf32>
    %293 = math.tanh %292 : vector<1x32xf32>
    %294 = arith.mulf %289, %293 : vector<1x32xf32>
    %295 = vector.extract_strided_slice %38 {offsets = [7, 0], sizes = [1, 128], strides = [1, 1]} : vector<8x128xf32> to vector<1x128xf32>
    %cst_63 = arith.constant dense<0.000000e+00> : vector<1x128xf32>
    %296 = tpu.matmul %279, %40, %cst_63 {dimension_numbers = #tpu.dot_dimension_numbers<[1], [0], [0], [1], [0, 0, 1, 1], [], []>} : vector<1x32xf32>, vector<32x128xf32>, vector<1x128xf32> -> vector<1x128xf32>
    %297 = arith.addf %295, %296 : vector<1x128xf32>
    %298 = vector.extract_strided_slice %39 {offsets = [0, 0], sizes = [1, 128], strides = [1, 1]} : vector<8x128xf32> to vector<1x128xf32>
    %cst_64 = arith.constant dense<0.000000e+00> : vector<1x128xf32>
    %299 = tpu.matmul %294, %41, %cst_64 {dimension_numbers = #tpu.dot_dimension_numbers<[1], [0], [0], [1], [0, 0, 1, 1], [], []>} : vector<1x32xf32>, vector<32x128xf32>, vector<1x128xf32> -> vector<1x128xf32>
    %300 = arith.addf %298, %299 : vector<1x128xf32>
    %301 = arith.negf %297 : vector<1x128xf32>
    %302 = math.exp %301 : vector<1x128xf32>
    %cst_65 = arith.constant 1.000000e+00 : f32
    %303 = vector.broadcast %cst_65 : f32 to vector<1x128xf32>
    %304 = arith.addf %303, %302 : vector<1x128xf32>
    %305 = arith.divf %303, %304 : vector<1x128xf32>
    %306 = math.tanh %297 : vector<1x128xf32>
    %307 = vector.extract_strided_slice %305 {offsets = [0, 0], sizes = [1, 32], strides = [1, 1]} : vector<1x128xf32> to vector<1x32xf32>
    %308 = vector.extract_strided_slice %305 {offsets = [0, 32], sizes = [1, 32], strides = [1, 1]} : vector<1x128xf32> to vector<1x32xf32>
    %309 = vector.extract_strided_slice %306 {offsets = [0, 64], sizes = [1, 32], strides = [1, 1]} : vector<1x128xf32> to vector<1x32xf32>
    %310 = vector.extract_strided_slice %305 {offsets = [0, 96], sizes = [1, 32], strides = [1, 1]} : vector<1x128xf32> to vector<1x32xf32>
    %311 = arith.mulf %308, %277 : vector<1x32xf32>
    %312 = arith.mulf %307, %309 : vector<1x32xf32>
    %313 = arith.addf %311, %312 : vector<1x32xf32>
    %314 = math.tanh %313 : vector<1x32xf32>
    %315 = arith.mulf %310, %314 : vector<1x32xf32>
    %316 = arith.negf %300 : vector<1x128xf32>
    %317 = math.exp %316 : vector<1x128xf32>
    %cst_66 = arith.constant 1.000000e+00 : f32
    %318 = vector.broadcast %cst_66 : f32 to vector<1x128xf32>
    %319 = arith.addf %318, %317 : vector<1x128xf32>
    %320 = arith.divf %318, %319 : vector<1x128xf32>
    %321 = math.tanh %300 : vector<1x128xf32>
    %322 = vector.extract_strided_slice %320 {offsets = [0, 0], sizes = [1, 32], strides = [1, 1]} : vector<1x128xf32> to vector<1x32xf32>
    %323 = vector.extract_strided_slice %320 {offsets = [0, 32], sizes = [1, 32], strides = [1, 1]} : vector<1x128xf32> to vector<1x32xf32>
    %324 = vector.extract_strided_slice %321 {offsets = [0, 64], sizes = [1, 32], strides = [1, 1]} : vector<1x128xf32> to vector<1x32xf32>
    %325 = vector.extract_strided_slice %320 {offsets = [0, 96], sizes = [1, 32], strides = [1, 1]} : vector<1x128xf32> to vector<1x32xf32>
    %326 = arith.mulf %323, %292 : vector<1x32xf32>
    %327 = arith.mulf %322, %324 : vector<1x32xf32>
    %328 = arith.addf %326, %327 : vector<1x32xf32>
    %329 = math.tanh %328 : vector<1x32xf32>
    %330 = arith.mulf %325, %329 : vector<1x32xf32>
    %331 = tpu.concatenate %63, %99, %135, %171, %207, %243, %279, %315 in 0 : vector<1x32xf32>, vector<1x32xf32>, vector<1x32xf32>, vector<1x32xf32>, vector<1x32xf32>, vector<1x32xf32>, vector<1x32xf32>, vector<1x32xf32> -> vector<8x32xf32>
    %332 = tpu.concatenate %330, %294, %258, %222, %186, %150, %114, %78 in 0 : vector<1x32xf32>, vector<1x32xf32>, vector<1x32xf32>, vector<1x32xf32>, vector<1x32xf32>, vector<1x32xf32>, vector<1x32xf32>, vector<1x32xf32> -> vector<8x32xf32>
    %c0_67 = arith.constant 0 : index
    %c0_68 = arith.constant 0 : index
    %333 = vector.load %arg6[%c0_67, %c0_68] : memref<32x128xf32, #tpu.memory_space<vmem>>, vector<32x128xf32>
    %cst_69 = arith.constant dense<0.000000e+00> : vector<8x128xf32>
    %334 = tpu.matmul %331, %333, %cst_69 {dimension_numbers = #tpu.dot_dimension_numbers<[1], [0], [0], [1], [0, 0, 1, 1], [], []>} : vector<8x32xf32>, vector<32x128xf32>, vector<8x128xf32> -> vector<8x128xf32>
    %c0_70 = arith.constant 0 : index
    %c0_71 = arith.constant 0 : index
    %335 = vector.load %arg7[%c0_70, %c0_71] : memref<32x128xf32, #tpu.memory_space<vmem>>, vector<32x128xf32>
    %cst_72 = arith.constant dense<0.000000e+00> : vector<8x128xf32>
    %336 = tpu.matmul %332, %335, %cst_72 {dimension_numbers = #tpu.dot_dimension_numbers<[1], [0], [0], [1], [0, 0, 1, 1], [], []>} : vector<8x32xf32>, vector<32x128xf32>, vector<8x128xf32> -> vector<8x128xf32>
    %337 = arith.addf %334, %336 : vector<8x128xf32>
    %c0_73 = arith.constant 0 : index
    %c0_74 = arith.constant 0 : index
    %338 = vector.load %arg8[%c0_73, %c0_74] : memref<1x128xf32, #tpu.memory_space<vmem>>, vector<1x128xf32>
    %339 = vector.broadcast %338 : vector<1x128xf32> to vector<8x128xf32>
    %340 = arith.addf %337, %339 : vector<8x128xf32>
    %cst_75 = arith.constant dense<0xFF800000> : vector<8xf32>
    %341 = vector.multi_reduction <maximumf>, %340, %cst_75 [1] : vector<8x128xf32> to vector<8xf32>
    %342 = vector.shape_cast %341 : vector<8xf32> to vector<8x1xf32>
    %343 = vector.broadcast %342 : vector<8x1xf32> to vector<8x128xf32>
    %344 = arith.subf %340, %343 : vector<8x128xf32>
    %345 = math.exp %344 : vector<8x128xf32>
    %cst_76 = arith.constant dense<0.000000e+00> : vector<8xf32>
    %346 = vector.multi_reduction <add>, %345, %cst_76 [1] : vector<8x128xf32> to vector<8xf32>
    %347 = vector.shape_cast %346 : vector<8xf32> to vector<8x1xf32>
    %348 = math.log %347 : vector<8x1xf32>
    %349 = vector.broadcast %348 : vector<8x1xf32> to vector<8x128xf32>
    %350 = arith.subf %344, %349 : vector<8x128xf32>
    %c0_77 = arith.constant 0 : index
    %c0_78 = arith.constant 0 : index
    %351 = vector.load %arg9[%c0_77, %c0_78] : memref<8x128xf32, #tpu.memory_space<vmem>>, vector<8x128xf32>
    tpu.vector_store %arg9[%c0_77, %c0_78], %350 {strides = array<i32>} : memref<8x128xf32, #tpu.memory_space<vmem>>, vector<8x128xf32>,
    return
  }
}

</mosaic_0001>

<bundles_post_ra>
// kernel: bilstm_forward.1
= control target key start
LH: loop header
LB: loop body
LE: loop exit
PB: predicated region body
PF: predicated region fallthrough
CT: control target
= control target key end

     0   :  { %14 = vsyncpa [#allocation5], 0  ;;  %s2114_s0 = inlined_call_operand.vmem [shape: s32[8], index: 0, kind: input, shape index: {}]   ;;  %s2115_s1 = inlined_call_operand.vmem [shape: f32[100,32], index: 1, kind: input, shape index: {}]   ;;  %s2116_s2 = inlined_call_operand.vmem [shape: f32[32,256], index: 2, kind: input, shape index: {}]   ;;  %s2117_s3 = inlined_call_operand.vmem [shape: f32[1,256], index: 3, kind: input, shape index: {}]   ;;  %s2118_s4 = inlined_call_operand.vmem [shape: f32[32,128], index: 4, kind: input, shape index: {}]   ;;  %s2119_s5 = inlined_call_operand.vmem [shape: f32[32,128], index: 5, kind: input, shape index: {}]   ;;  %s2120_s6 = inlined_call_operand.hbm [shape: f32[32,128], index: 6, kind: input, shape index: {}]   ;;  %s2121_s7 = inlined_call_operand.hbm [shape: f32[32,128], index: 7, kind: input, shape index: {}]   ;;  %s2122_s8 = inlined_call_operand.vmem [shape: f32[1,128], index: 8, kind: input, shape index: {}]   ;;  %s2123_s9 = inlined_call_operand.vmem [shape: f32[8,128], index: 9, kind: output, shape index: {}]  }
   0x1   :  { %15 = vsyncpa [#allocation4], 0  ;;  %s22_s11 = sshll.u32 %s2114_s0, 4  ;;  %s23_s11 = int_to_ptr.vmem [resolvable:$true] %s22_s11 }
   0x2   :  { %16 = vsyncpa [#allocation8], 0  ;;  %s40_s14 = sshll.u32 %s2120_s6, 4  ;;  %s1633_s15 = smov [#allocation3]   ;;  %s41_s14 = int_to_ptr.hbm [resolvable:$true] %s40_s14 }
   0x3   :  { %25 = dma.vmem_to_smem %s23_s11, 16, %s1633_s15, [#allocation5]  }
   0x4   :  { %s1634_s16 = smov [#allocation6]   ;;  %s1635_s18 = smov 128  }
   0x5   :  { %s42_s17 = sshll.u32 %s1634_s16, 4  ;;  %s1636_s19 = smov 8   ;;  %s43_s17 = int_to_ptr.vmem [resolvable:$true] %s42_s17 }
   0x6   :  { %48 = dma.hbm_to_vmem [thread:$0]  %s41_s14, 512, %s43_s17, [#allocation4], %s1635_s18, %s1635_s18, %s1636_s19  }
   0x7   :  { %s53_s22 = sshll.u32 %s2121_s7, 4  ;;  %s1637_s0 = smov [#allocation7]   ;;  %s54_s22 = int_to_ptr.hbm [resolvable:$true] %s53_s22 }
   0x8   :  { %s55_s23 = sshll.u32 %s1637_s0, 4  ;;  %s56_s23 = int_to_ptr.vmem [resolvable:$true] %s55_s23 }
   0x9   :  { %61 = dma.hbm_to_vmem [thread:$0]  %s54_s22, 512, %s56_s23, [#allocation8], %s1635_s18, %s1635_s18, %s1636_s19  }
   0xa   :  { %1627 = dma.done.wait [#allocation5], 16  }
   0xb   :  { %1628 = vsyncadd [#allocation5], 4294967280 }
   0xc   :  { %1629 = dma.done.wait [#allocation4], 512  }
   0xd   :  { %1630 = vsyncadd [#allocation4], 4294966784 }
   0xe   :  { %1631 = dma.done.wait [#allocation8], 512  }
   0xf   :  { %1632 = vsyncadd [#allocation8], 4294966784 }
  0x10   :  { %76 = sfence }
  0x11   :  { %v1703_v0 = vld [vmem:[%s2119_s5 + $0x18] sm:$0xff]  ;;  %v1713_v2 = vld [vmem:[%s2119_s5 + $0x10] sm:$0xff]  ;;  %s1715_s28 = sld [smem:[#allocation3]]  ;;  %v1732_v5 = vld [vmem:[%s2119_s5 + $0x8] sm:$0xff]  ;;  %vm80_vm0 = vcmask 253952   ;;  %v1638_v16 = vmov 0.0  }
  0x12   :  { %v1708_v1 = vld [vmem:[%s2118_s4 + $0x18] sm:$0xff]  ;;  %213 = vmatpush.msra.mxu3 %v1703_v0  ;;  %v1722_v3 = vld [vmem:[%s2118_s4 + $0x10] sm:$0xff]  ;;  %s1727_s12 = sld [smem:[#allocation3 + $0x1]]  ;;  %v1740_v7 = vld [vmem:[%s2118_s4 + $0x8] sm:$0xff]  ;;  %vm125_vm1 = vcmask 261120  }
  0x13   :  { %192 = vmatpush.msra.mxu2 %v1708_v1  ;;  %v117_v4 = vld [vmem:[%s2116_s2 + $0x30] sm:$0xff]  ;;  %v118_v6 = vld [vmem:[%s2116_s2 + $0x38] sm:$0xff]  ;;  %s1742_s19 = sld [smem:[#allocation3 + $0x2]]  ;;  %v115_v8 = vld [vmem:[%s2116_s2 + $0x20] sm:$0xff] }
  0x14   :  { %141 = vmatpush.msra.mxu0 %v117_v4  ;;  %214 = vmatpush.msra.mxu3 %v1713_v2  ;;  %v116_v9 = vld [vmem:[%s2116_s2 + $0x28] sm:$0xff]  ;;  %s1752_s23 = sld [smem:[#allocation3 + $0x3]]  ;;  %v1757_v10 = vld [vmem:[%s2119_s5] sm:$0xff]  ;;  %v113_v12 = vld [vmem:[%s2116_s2 + $0x10] sm:$0xff] }
  0x15   :  { %193 = vmatpush.msra.mxu2 %v1722_v3  ;;  %161 = vmatpush.msra.mxu1 %v118_v6  ;;  %v1762_v11 = vld [vmem:[%s2118_s4] sm:$0xff]  ;;  %s1767_s29 = sld [smem:[#allocation3 + $0x4]]  ;;  %v114_v13 = vld [vmem:[%s2116_s2 + $0x18] sm:$0xff]  ;;  %v112_v17 = vld [vmem:[%s2116_s2 + $0x8] sm:$0xff] }
  0x16   :  { %142 = vmatpush.msra.mxu0 %v115_v8  ;;  %215 = vmatpush.msra.mxu3 %v1732_v5  ;;  %s1771_s5 = sld [smem:[#allocation3 + $0x5]]  ;;  %v111_v14 = vld [vmem:[%s2116_s2] sm:$0xff] }
  0x17   :  { %194 = vmatpush.msra.mxu2 %v1740_v7  ;;  %162 = vmatpush.msra.mxu1 %v116_v9  ;;  %s78_s15 = scalar_lea.vmem %s2115_s1, %s1715_s28  ;;  %s1783_s16 = sld [smem:[#allocation3 + $0x6]]  ;;  %v119_v26 = vld [vmem:[%s2117_s3] sm:$0x3] }
  0x18   :  { %143 = vmatpush.msra.mxu0 %v113_v12  ;;  %216 = vmatpush.msra.mxu3 %v1757_v10  ;;  %v79_v15 = vld [vmem:[%s78_s15] sm:$0x1]  ;;  %s83_s20 = scalar_lea.vmem %s2115_s1, %s1727_s12  ;;  %s1791_s21 = sld [smem:[#allocation3 + $0x7]]  ;;  %v122_v28 = vperm.slane %v119_v26, 1  ;;  %v121_v31 = vperm.slane %v119_v26, 0 }
  0x19   :  { %195 = vmatpush.msra.mxu2 %v1762_v11  ;;  %217 = vmatmul.f32.vlgmr.msra.gmra.mxu3 %v1638_v16  ;;  %81 = vst.msk [vmem:[#allocation2] sm:$0x1] %vm80_vm0, %v79_v15  ;;  %v84_v18 = vld [vmem:[%s83_s20] sm:$0x1]  ;;  %s87_s24 = scalar_lea.vmem %s2115_s1, %s1742_s19  ;;  %s1639_s15 = smov 64  }
  0x1a   :  { %196 = vmatmul.f32.vlgmr.msra.gmra.mxu2 %v1638_v16  ;;  %163 = vmatpush.msra.mxu1 %v114_v13  ;;  %85 = vst.msk [vmem:[#allocation2 + $0x1] sm:$0x1] %vm80_vm0, %v84_v18  ;;  %v88_v19 = vld [vmem:[%s87_s24] sm:$0x1]  ;;  %s91_s26 = scalar_lea.vmem %s2115_s1, %s1752_s23  ;;  %s1640_s3 = smov 32  }
  0x1b   :  { %144 = vmatpush.msra.mxu0 %v111_v14  ;;  %89 = vst.msk [vmem:[#allocation2 + $0x2] sm:$0x1] %vm80_vm0, %v88_v19  ;;  %v92_v20 = vld [vmem:[%s91_s26] sm:$0x1]  ;;  %s95_s27 = scalar_lea.vmem %s2115_s1, %s1767_s29  ;;  %486 = vmatpush.msrb.mxu3 %v1703_v0 }
  0x1c   :  { %164 = vmatpush.msra.mxu1 %v112_v17  ;;  %93 = vst.msk [vmem:[#allocation2 + $0x3] sm:$0x1] %vm80_vm0, %v92_v20  ;;  %v96_v21 = vld [vmem:[%s95_s27] sm:$0x1]  ;;  %s99_s23 = scalar_lea.vmem %s2115_s1, %s1771_s5  ;;  %456 = vmatpush.msrb.mxu2 %v1708_v1 }
  0x1d   :  { %316 = vmatpush.msrb.mxu0 %v1708_v1  ;;  %97 = vst.msk [vmem:[#allocation2 + $0x4] sm:$0x1] %vm80_vm0, %v96_v21  ;;  %v100_v22 = vld [vmem:[%s99_s23] sm:$0x1]  ;;  %s103_s29 = scalar_lea.vmem %s2115_s1, %s1783_s16  ;;  %487 = vmatpush.msrb.mxu3 %v1713_v2 }
  0x1e   :  { %346 = vmatpush.msrb.mxu1 %v1703_v0  ;;  %101 = vst.msk [vmem:[#allocation2 + $0x5] sm:$0x1] %vm80_vm0, %v100_v22  ;;  %v104_v23 = vld [vmem:[%s103_s29] sm:$0x1]  ;;  %s107_s5 = scalar_lea.vmem %s2115_s1, %s1791_s21  ;;  %457 = vmatpush.msrb.mxu2 %v1722_v3 }
  0x1f   :  { %317 = vmatpush.msrb.mxu0 %v1722_v3  ;;  %105 = vst.msk [vmem:[#allocation2 + $0x6] sm:$0x1] %vm80_vm0, %v104_v23  ;;  %v108_v24 = vld [vmem:[%s107_s5] sm:$0x1]  ;;  %488 = vmatpush.msrb.mxu3 %v1732_v5 }
  0x20   :  { %347 = vmatpush.msrb.mxu1 %v1713_v2  ;;  %109 = vst.msk [vmem:[#allocation2 + $0x7] sm:$0x1] %vm80_vm0, %v108_v24  ;;  %458 = vmatpush.msrb.mxu2 %v1740_v7 }
  0x21   :  { %318 = vmatpush.msrb.mxu0 %v1740_v7  ;;  %489 = vmatpush.msrb.mxu3 %v1757_v10 }
  0x22   :  { %348 = vmatpush.msrb.mxu1 %v1732_v5  ;;  %459 = vmatpush.msrb.mxu2 %v1762_v11 }
  0x23   :  { %319 = vmatpush.msrb.mxu0 %v1762_v11  ;;  %766 = vmatpush.msra.mxu3 %v1703_v0 }
  0x24   :  { %349 = vmatpush.msrb.mxu1 %v1757_v10  ;;  %736 = vmatpush.msra.mxu2 %v1708_v1 }
  0x25   :  { %767 = vmatpush.msra.mxu3 %v1713_v2 }
  0x26   :  { %737 = vmatpush.msra.mxu2 %v1722_v3 }
  0x27   :  { %v110_v25 = vld [vmem:[#allocation2] sm:$0xff]  ;;  %768 = vmatpush.msra.mxu3 %v1732_v5 }
  0x28   :  { %1392 = vmatmul.msk.f32.vlgmr.msra.gmra.mxu0 %vm125_vm1, %v110_v25  ;;  %1393 = vmatmul.msk.f32.vlgmr.msra.gmra.mxu1 %vm125_vm1, %v110_v25 }
  0x29   :  { %626 = vmatpush.msra.mxu1 %v1703_v0  ;;  %596 = vmatpush.msra.mxu0 %v1708_v1 }
  0x2a   :  { %769 = vmatpush.msra.mxu3 %v1757_v10  ;;  %738 = vmatpush.msra.mxu2 %v1740_v7 }
  0x2b   :  { %627 = vmatpush.msra.mxu1 %v1713_v2  ;;  %597 = vmatpush.msra.mxu0 %v1722_v3 }
  0x2c   :  { %739 = vmatpush.msra.mxu2 %v1762_v11 }
  0x2d   :  { %628 = vmatpush.msra.mxu1 %v1732_v5  ;;  %598 = vmatpush.msra.mxu0 %v1740_v7 }
  0x2f   :  { %629 = vmatpush.msra.mxu1 %v1757_v10  ;;  %599 = vmatpush.msra.mxu0 %v1762_v11 }
  0x9c   :  { %v218_v27 = vpop.f32.mrf.mxu3 }
  0x9d   :  { %v222_v29 = vrot.slane %v218_v27, 1  ;;  %v197_v36 = vpop.f32.mrf.mxu2 }
  0xa5   :  { %v166_v30 = vpop.f32.mrf.mxu1  ;;  %v146_v33 = vpop.f32.mrf.mxu0 }
  0xa6   :  { %v1865_v32 = vadd.f32 %v166_v30, %v122_v28  ;;  %v1868_v35 = vadd.f32 %v146_v33, %v121_v31 }
  0xa8   :  { %v224_v34 = vadd.f32 %v222_v29, %v1865_v32  ;;  %v200_v37 = vadd.f32 %v197_v36, %v1868_v35 }
  0xaa   :  { %1435 = vtanh.f32 %v224_v34  ;;  %v1395_v40 = vmul.f32 -1.442695, %v224_v34  ;;  %v1394_v41 = vmul.f32 -1.442695, %v200_v37 }
  0xab   :  { %1437 = vtanh.f32 %v200_v37 }
  0xac   :  { %1439 = vpow2.f32 %v1395_v40 }
  0xad   :  { %1441 = vpow2.f32 %v1394_v41 }
  0xb0   :  { %v1436_v38 = vpop.eup %1435 }
  0xb1   :  { %284 = vrot.lane.b32.xlu0 %v1436_v38, %s1639_s15  ;;  %v1438_v39 = vpop.eup %1437 }
  0xb2   :  { %v1440_v42 = vpop.eup %1439 }
  0xb3   :  { %v265_v43 = vadd.f32 1.0, %v1440_v42  ;;  %v1442_v44 = vpop.eup %1441 }
  0xb4   :  { %v228_v45 = vadd.f32 1.0, %v1442_v44 }
  0xb5   :  { %1443 = vrcp.f32 %v265_v43  ;;  %v277_v54 = vand.u32 2147483648, %v265_v43  ;;  %vm271_vm3 = vweird.f32 %v265_v43  ;;  %v275_v55 = vand.u32 2147483647, %v265_v43 }
  0xb6   :  { %1445 = vrcp.f32 %v228_v45  ;;  %vm234_vm6 = vweird.f32 %v228_v45  ;;  %v240_v63 = vand.u32 2147483648, %v228_v45  ;;  %v238_v4 = vand.u32 2147483647, %v228_v45 }
  0xb7   :  { %v278_v58 = vor.u32 1.1754944e-38, %v277_v54  ;;  %vm276_vm5 = vcmp.eq.f32.partialorder %v275_v55, 8.507059e+37 }
  0xb8   :  { %v241_v8 = vor.u32 1.1754944e-38, %v240_v63  ;;  %vm239_vm9 = vcmp.eq.f32.partialorder %v238_v4, 8.507059e+37 }
  0xb9   :  { %247 = vrot.lane.b32.xlu0 %v1438_v39, %s1639_s15 }
  0xbb   :  { %v1444_v46 = vpop.eup %1443 }
  0xbc   :  { %v267_v47 = vmul.f32 %v1444_v46, %v265_v43  ;;  %v1446_v49 = vpop.eup %1445  ;;  %vm272_vm2 = vweird.f32 %v1444_v46 }
  0xbd   :  { %v230_v51 = vmul.f32 %v1446_v49, %v228_v45  ;;  %vm273_vm4 = vmor %vm271_vm3, %vm272_vm2  ;;  %vm235_vm7 = vweird.f32 %v1446_v49 }
  0xbe   :  { %v268_v48 = vsub.f32 1.0, %v267_v47  ;;  %vm236_vm8 = vmor %vm234_vm6, %vm235_vm7 }
  0xbf   :  { %v231_v53 = vsub.f32 1.0, %v230_v51 }
  0xc0   :  { %v269_v50 = vmul.f32 %v1444_v46, %v268_v48 }
  0xc1   :  { %v232_v57 = vmul.f32 %v1446_v49, %v231_v53 }
  0xc2   :  { %v270_v52 = vadd.f32 %v1444_v46, %v269_v50 }
  0xc3   :  { %v233_v62 = vadd.f32 %v1446_v49, %v232_v57 }
  0xc4   :  { %v274_v56 = vsel %vm273_vm4, %v1444_v46, %v270_v52 }
  0xc5   :  { %v279_v60 = vsel %vm276_vm5, %v278_v58, %v274_v56  ;;  %v237_v6 = vsel %vm236_vm8, %v1446_v49, %v233_v62 }
  0xc6   :  { %v242_v12 = vsel %vm239_vm9, %v241_v8, %v237_v6  ;;  %v282_v14 = vmul.f32 0.0, %v279_v60 }
  0xc7   :  { %v245_v17 = vmul.f32 0.0, %v242_v12 }
 0x123   :  { %v285_v59 = vpop.permute.xlu0 %284 }
 0x124   :  { %v287_v61 = vmul.f32 %v285_v59, %v279_v60 }
 0x126   :  { %289 = vrot.lane.b32.xlu1 %v287_v61, %s1640_s3 }
 0x12b   :  { %v248_v9 = vpop.permute.xlu0 %247 }
 0x12c   :  { %v250_v13 = vmul.f32 %v248_v9, %v242_v12 }
 0x12e   :  { %252 = vrot.lane.b32.xlu1 %v250_v13, %s1640_s3 }
 0x198   :  { %v290_v15 = vpop.permute.xlu1 %289 }
 0x199   :  { %v1875_v16 = vadd.f32 %v290_v15, %v282_v14 }
 0x19b   :  { %1447 = vtanh.f32 %v1875_v16  ;;  %v419_v13 = vrot.slane %v1875_v16, 1 }
 0x1a0   :  { %v253_v18 = vpop.permute.xlu1 %252 }
 0x1a1   :  { %v1448_v19 = vpop.eup %1447  ;;  %v1878_v20 = vadd.f32 %v253_v18, %v245_v17 }
 0x1a2   :  { %295 = vrot.lane.b32.xlu2 %v1448_v19, %s1639_s15 }
 0x1a3   :  { %1449 = vtanh.f32 %v1878_v20  ;;  %v379_v18 = vrot.slane %v1878_v20, 7 }
 0x1a9   :  { %v1450_v21 = vpop.eup %1449 }
 0x1aa   :  { %258 = vrot.lane.b32.xlu2 %v1450_v21, %s1639_s15 }
 0x1fc   :  { %v296_v22 = vpop.permute.xlu2 %295 }
 0x1fd   :  { %v1883_v23 = vmul.f32 %v296_v22, %v279_v60 }
 0x1ff   :  { %v329_v24 = vrot.slane %v1883_v23, 7 }
 0x201   :  { %330 = vrot.lane.b32.xlu0 %v329_v24, %s1640_s3 }
 0x204   :  { %v259_v25 = vpop.permute.xlu2 %258 }
 0x205   :  { %v1887_v26 = vmul.f32 %v259_v25, %v242_v12 }
 0x207   :  { %300 = vrot.lane.b32.xlu1 %v1887_v26, %s1640_s3 }
 0x273   :  { %v331_v27 = vpop.permute.xlu0 %330 }
 0x274   :  { %1397 = vmatmul.msk.f32.vlgmr.msrb.gmra.mxu1 %vm125_vm1, %v331_v27 }
 0x275   :  { %906 = vmatpush.msrb.mxu1 %v1703_v0 }
 0x277   :  { %907 = vmatpush.msrb.mxu1 %v1713_v2 }
 0x279   :  { %v301_v28 = vpop.permute.xlu1 %300  ;;  %908 = vmatpush.msrb.mxu1 %v1732_v5 }
 0x27a   :  { %1396 = vmatmul.msk.f32.vlgmr.msrb.gmra.mxu0 %vm125_vm1, %v301_v28 }
 0x27b   :  { %909 = vmatpush.msrb.mxu1 %v1757_v10  ;;  %876 = vmatpush.msrb.mxu0 %v1708_v1 }
 0x27d   :  { %877 = vmatpush.msrb.mxu0 %v1722_v3 }
 0x27f   :  { %878 = vmatpush.msrb.mxu0 %v1740_v7 }
 0x281   :  { %879 = vmatpush.msrb.mxu0 %v1762_v11 }
 0x2f1   :  { %v351_v29 = vpop.f32.mrf.mxu1 }
 0x2f2   :  { %v355_v30 = vrot.slane %v351_v29, 2 }
 0x2f4   :  { %v357_v31 = vadd.f32 %v355_v30, %v1865_v32 }
 0x2f6   :  { %1451 = vtanh.f32 %v357_v31  ;;  %v1399_v39 = vmul.f32 -1.442695, %v357_v31 }
 0x2f7   :  { %v321_v33 = vpop.f32.mrf.mxu0 }
 0x2f8   :  { %v325_v34 = vrot.slane %v321_v33, 7 }
 0x2fa   :  { %v327_v36 = vadd.f32 %v325_v34, %v1868_v35 }
 0x2fc   :  { %v1452_v37 = vpop.eup %1451  ;;  %1453 = vtanh.f32 %v327_v36  ;;  %v1398_v44 = vmul.f32 -1.442695, %v327_v36 }
 0x2fd   :  { %423 = vrot.lane.b32.xlu2 %v1452_v37, %s1639_s15  ;;  %1455 = vpow2.f32 %v1399_v39 }
 0x302   :  { %v1454_v38 = vpop.eup %1453 }
 0x303   :  { %383 = vrot.lane.b32.xlu0 %v1454_v38, %s1639_s15  ;;  %v1456_v40 = vpop.eup %1455 }
 0x304   :  { %v401_v41 = vadd.f32 1.0, %v1456_v40 }
 0x306   :  { %1457 = vrcp.f32 %v401_v41  ;;  %v413_v48 = vand.u32 2147483648, %v401_v41  ;;  %vm407_vm11 = vweird.f32 %v401_v41  ;;  %v411_v50 = vand.u32 2147483647, %v401_v41 }
 0x307   :  { %1459 = vpow2.f32 %v1398_v44 }
 0x308   :  { %v414_v53 = vor.u32 1.1754944e-38, %v413_v48  ;;  %vm412_vm13 = vcmp.eq.f32.partialorder %v411_v50, 8.507059e+37 }
 0x30c   :  { %v1458_v42 = vpop.eup %1457 }
 0x30d   :  { %v403_v43 = vmul.f32 %v1458_v42, %v401_v41  ;;  %vm408_vm10 = vweird.f32 %v1458_v42  ;;  %v1460_v49 = vpop.eup %1459 }
 0x30e   :  { %vm409_vm12 = vmor %vm407_vm11, %vm408_vm10  ;;  %v361_v52 = vadd.f32 1.0, %v1460_v49  ;;  %vm1275_vm11 = vcmask 1040384  }
 0x30f   :  { %v404_v45 = vsub.f32 1.0, %v403_v43 }
 0x310   :  { %1461 = vrcp.f32 %v361_v52  ;;  %v373_v62 = vand.u32 2147483648, %v361_v52  ;;  %vm367_vm15 = vweird.f32 %v361_v52  ;;  %v371_v63 = vand.u32 2147483647, %v361_v52 }
 0x311   :  { %v405_v46 = vmul.f32 %v1458_v42, %v404_v45 }
 0x312   :  { %v374_v6 = vor.u32 1.1754944e-38, %v373_v62  ;;  %vm372_vm2 = vcmp.eq.f32.partialorder %v371_v63, 8.507059e+37 }
 0x313   :  { %v406_v47 = vadd.f32 %v1458_v42, %v405_v46 }
 0x315   :  { %v410_v51 = vsel %vm409_vm12, %v1458_v42, %v406_v47  ;;  %vm1277_vm12 = vcmask 1041408  }
 0x316   :  { %v415_v54 = vsel %vm412_vm13, %v414_v53, %v410_v51  ;;  %v1462_v57 = vpop.eup %1461 }
 0x317   :  { %v363_v58 = vmul.f32 %v1462_v57, %v361_v52  ;;  %vm368_vm14 = vweird.f32 %v1462_v57  ;;  %v421_v14 = vmul.f32 %v419_v13, %v415_v54 }
 0x318   :  { %vm369_vm0 = vmor %vm367_vm15, %vm368_vm14 }
 0x319   :  { %v364_v59 = vsub.f32 1.0, %v363_v58 }
 0x31b   :  { %v365_v60 = vmul.f32 %v1462_v57, %v364_v59 }
 0x31d   :  { %v366_v61 = vadd.f32 %v1462_v57, %v365_v60 }
 0x31f   :  { %v370_v4 = vsel %vm369_vm0, %v1462_v57, %v366_v61 }
 0x320   :  { %v375_v9 = vsel %vm372_vm2, %v374_v6, %v370_v4 }
 0x321   :  { %v381_v19 = vmul.f32 %v379_v18, %v375_v9 }
 0x357   :  { %v424_v55 = vpop.permute.xlu2 %423 }
 0x358   :  { %v426_v56 = vmul.f32 %v424_v55, %v415_v54 }
 0x35a   :  { %428 = vrot.lane.b32.xlu1 %v426_v56, %s1640_s3 }
 0x375   :  { %v384_v8 = vpop.permute.xlu0 %383 }
 0x376   :  { %v386_v12 = vmul.f32 %v384_v8, %v375_v9 }
 0x378   :  { %388 = vrot.lane.b32.xlu2 %v386_v12, %s1640_s3 }
 0x3cc   :  { %v429_v15 = vpop.permute.xlu1 %428 }
 0x3cd   :  { %v1908_v17 = vadd.f32 %v429_v15, %v421_v14 }
 0x3cf   :  { %1463 = vtanh.f32 %v1908_v17 }
 0x3d2   :  { %v389_v21 = vpop.permute.xlu2 %388 }
 0x3d3   :  { %v1912_v22 = vadd.f32 %v389_v21, %v381_v19  ;;  %v559_v19 = vrot.slane %v1908_v17, 1 }
 0x3d5   :  { %v1464_v24 = vpop.eup %1463  ;;  %1465 = vtanh.f32 %v1912_v22 }
 0x3d6   :  { %434 = vrot.lane.b32.xlu0 %v1464_v24, %s1639_s15 }
 0x3db   :  { %v1466_v25 = vpop.eup %1465 }
 0x3dc   :  { %394 = vrot.lane.b32.xlu1 %v1466_v25, %s1639_s15 }
 0x448   :  { %v435_v16 = vpop.permute.xlu0 %434 }
 0x449   :  { %v1917_v27 = vmul.f32 %v435_v16, %v415_v54  ;;  %v519_v16 = vrot.slane %v1912_v22, 7 }
 0x44b   :  { %v469_v28 = vrot.slane %v1917_v27, 6 }
 0x44d   :  { %470 = vrot.lane.b32.xlu2 %v469_v28, %s1640_s3 }
 0x44e   :  { %v395_v20 = vpop.permute.xlu1 %394 }
 0x44f   :  { %v1921_v29 = vmul.f32 %v395_v20, %v375_v9 }
 0x451   :  { %v439_v30 = vrot.slane %v1921_v29, 1 }
 0x453   :  { %440 = vrot.lane.b32.xlu0 %v439_v30, %s1640_s3 }
 0x4a7   :  { %v471_v31 = vpop.permute.xlu2 %470 }
 0x4a8   :  { %1401 = vmatmul.msk.f32.vlgmr.msrb.gmra.mxu3 %vm125_vm1, %v471_v31 }
 0x4a9   :  { %1046 = vmatpush.msrb.mxu3 %v1703_v0 }
 0x4ab   :  { %1047 = vmatpush.msrb.mxu3 %v1713_v2 }
 0x4ad   :  { %1048 = vmatpush.msrb.mxu3 %v1732_v5 }
 0x4af   :  { %1049 = vmatpush.msrb.mxu3 %v1757_v10 }
 0x4c5   :  { %v441_v33 = vpop.permute.xlu0 %440 }
 0x4c6   :  { %1400 = vmatmul.msk.f32.vlgmr.msrb.gmra.mxu2 %vm125_vm1, %v441_v33 }
 0x4c7   :  { %1016 = vmatpush.msrb.mxu2 %v1708_v1 }
 0x4c9   :  { %1017 = vmatpush.msrb.mxu2 %v1722_v3 }
 0x4cb   :  { %1018 = vmatpush.msrb.mxu2 %v1740_v7 }
 0x4cd   :  { %1019 = vmatpush.msrb.mxu2 %v1762_v11 }
 0x52b   :  { %v491_v34 = vpop.f32.mrf.mxu3 }
 0x52c   :  { %v495_v36 = vrot.slane %v491_v34, 3 }
 0x52e   :  { %v497_v37 = vadd.f32 %v495_v36, %v1865_v32 }
 0x530   :  { %1467 = vtanh.f32 %v497_v37  ;;  %v1403_v43 = vmul.f32 -1.442695, %v497_v37 }
 0x536   :  { %v1468_v38 = vpop.eup %1467 }
 0x537   :  { %563 = vrot.lane.b32.xlu1 %v1468_v38, %s1639_s15  ;;  %v1276_v38 = vsel %vm1275_vm11, %v1887_v26, %v1921_v29 }
 0x549   :  { %v461_v39 = vpop.f32.mrf.mxu2 }
 0x54a   :  { %v465_v40 = vrot.slane %v461_v39, 6 }
 0x54c   :  { %v467_v41 = vadd.f32 %v465_v40, %v1868_v35 }
 0x54e   :  { %1469 = vtanh.f32 %v467_v41  ;;  %v1402_v44 = vmul.f32 -1.442695, %v467_v41 }
 0x54f   :  { %1471 = vpow2.f32 %v1403_v43 }
 0x550   :  { %1473 = vpow2.f32 %v1402_v44 }
 0x554   :  { %v1470_v42 = vpop.eup %1469 }
 0x555   :  { %523 = vrot.lane.b32.xlu2 %v1470_v42, %s1639_s15  ;;  %v1472_v45 = vpop.eup %1471 }
 0x556   :  { %v541_v46 = vadd.f32 1.0, %v1472_v45  ;;  %v1474_v47 = vpop.eup %1473 }
 0x557   :  { %v501_v48 = vadd.f32 1.0, %v1474_v47 }
 0x558   :  { %1475 = vrcp.f32 %v541_v46  ;;  %v553_v57 = vand.u32 2147483648, %v541_v46  ;;  %vm547_vm4 = vweird.f32 %v541_v46  ;;  %v551_v58 = vand.u32 2147483647, %v541_v46 }
 0x559   :  { %1477 = vrcp.f32 %v501_v48  ;;  %v513_v6 = vand.u32 2147483648, %v501_v48  ;;  %vm507_vm8 = vweird.f32 %v501_v48  ;;  %v511_v9 = vand.u32 2147483647, %v501_v48 }
 0x55a   :  { %v554_v61 = vor.u32 1.1754944e-38, %v553_v57  ;;  %vm552_vm6 = vcmp.eq.f32.partialorder %v551_v58, 8.507059e+37 }
 0x55b   :  { %v514_v13 = vor.u32 1.1754944e-38, %v513_v6  ;;  %vm512_vm10 = vcmp.eq.f32.partialorder %v511_v9, 8.507059e+37 }
 0x55e   :  { %v1476_v49 = vpop.eup %1475 }
 0x55f   :  { %v543_v50 = vmul.f32 %v1476_v49, %v541_v46  ;;  %v1478_v51 = vpop.eup %1477  ;;  %vm548_vm3 = vweird.f32 %v1476_v49 }
 0x560   :  { %v503_v53 = vmul.f32 %v1478_v51, %v501_v48  ;;  %vm549_vm5 = vmor %vm547_vm4, %vm548_vm3  ;;  %vm508_vm7 = vweird.f32 %v1478_v51 }
 0x561   :  { %v544_v52 = vsub.f32 1.0, %v543_v50  ;;  %vm509_vm9 = vmor %vm507_vm8, %vm508_vm7 }
 0x562   :  { %v504_v55 = vsub.f32 1.0, %v503_v53 }
 0x563   :  { %v545_v54 = vmul.f32 %v1476_v49, %v544_v52 }
 0x564   :  { %v505_v59 = vmul.f32 %v1478_v51, %v504_v55 }
 0x565   :  { %v546_v56 = vadd.f32 %v1476_v49, %v545_v54 }
 0x566   :  { %v506_v62 = vadd.f32 %v1478_v51, %v505_v59 }
 0x567   :  { %v550_v60 = vsel %vm549_vm5, %v1476_v49, %v546_v56 }
 0x568   :  { %v555_v4 = vsel %vm552_vm6, %v554_v61, %v550_v60  ;;  %v510_v12 = vsel %vm509_vm9, %v1478_v51, %v506_v62  ;;  %vm1279_vm6 = vcmask 1042432  }
 0x569   :  { %v515_v14 = vsel %vm512_vm10, %v514_v13, %v510_v12  ;;  %v561_v21 = vmul.f32 %v559_v19, %v555_v4 }
 0x56a   :  { %v521_v28 = vmul.f32 %v519_v16, %v515_v14 }
 0x5a9   :  { %v564_v63 = vpop.permute.xlu1 %563 }
 0x5aa   :  { %v566_v8 = vmul.f32 %v564_v63, %v555_v4 }
 0x5ac   :  { %568 = vrot.lane.b32.xlu0 %v566_v8, %s1640_s3 }
 0x5af   :  { %v524_v15 = vpop.permute.xlu2 %523 }
 0x5b0   :  { %v526_v18 = vmul.f32 %v524_v15, %v515_v14 }
 0x5b2   :  { %528 = vrot.lane.b32.xlu1 %v526_v18, %s1640_s3 }
 0x61e   :  { %v569_v24 = vpop.permute.xlu0 %568 }
 0x61f   :  { %v1942_v25 = vadd.f32 %v569_v24, %v561_v21 }
 0x621   :  { %1479 = vtanh.f32 %v1942_v25  ;;  %v699_v15 = vrot.slane %v1942_v25, 1 }
 0x624   :  { %v529_v20 = vpop.permute.xlu1 %528 }
 0x625   :  { %v1946_v30 = vadd.f32 %v529_v20, %v521_v28 }
 0x627   :  { %v1480_v31 = vpop.eup %1479  ;;  %1481 = vtanh.f32 %v1946_v30  ;;  %v659_v16 = vrot.slane %v1946_v30, 7 }
 0x628   :  { %574 = vrot.lane.b32.xlu2 %v1480_v31, %s1639_s15 }
 0x62d   :  { %v1482_v33 = vpop.eup %1481 }
 0x62e   :  { %534 = vrot.lane.b32.xlu0 %v1482_v33, %s1639_s15 }
 0x682   :  { %v575_v17 = vpop.permute.xlu2 %574 }
 0x683   :  { %v1951_v34 = vmul.f32 %v575_v17, %v555_v4 }
 0x685   :  { %v609_v36 = vrot.slane %v1951_v34, 5 }
 0x687   :  { %610 = vrot.lane.b32.xlu1 %v609_v36, %s1640_s3 }
 0x6a0   :  { %v535_v22 = vpop.permute.xlu0 %534 }
 0x6a1   :  { %v537_v37 = vmul.f32 %v535_v22, %v515_v14 }
 0x6a3   :  { %v579_v39 = vrot.slane %v537_v37, 2  ;;  %v1959_v40 = vsel %vm1277_vm12, %v1276_v38, %v537_v37 }
 0x6a5   :  { %580 = vrot.lane.b32.xlu2 %v579_v39, %s1640_s3 }
 0x6f9   :  { %v611_v41 = vpop.permute.xlu1 %610 }
 0x6fa   :  { %1405 = vmatmul.msk.f32.vlgmr.msra.gmra.mxu1 %vm125_vm1, %v611_v41 }
 0x6fb   :  { %1186 = vmatpush.msra.mxu1 %v1703_v0 }
 0x6fd   :  { %1187 = vmatpush.msra.mxu1 %v1713_v2 }
 0x6ff   :  { %v581_v42 = vpop.permute.xlu2 %580  ;;  %1188 = vmatpush.msra.mxu1 %v1732_v5 }
 0x700   :  { %1404 = vmatmul.msk.f32.vlgmr.msra.gmra.mxu0 %vm125_vm1, %v581_v42 }
 0x701   :  { %1156 = vmatpush.msra.mxu0 %v1708_v1  ;;  %1189 = vmatpush.msra.mxu1 %v1757_v10 }
 0x703   :  { %1157 = vmatpush.msra.mxu0 %v1722_v3 }
 0x705   :  { %1158 = vmatpush.msra.mxu0 %v1740_v7 }
 0x707   :  { %1159 = vmatpush.msra.mxu0 %v1762_v11 }
 0x777   :  { %v631_v26 = vpop.f32.mrf.mxu1 }
 0x778   :  { %v635_v29 = vrot.slane %v631_v26, 4 }
 0x77a   :  { %v637_v0 = vadd.f32 %v635_v29, %v1865_v32 }
 0x77c   :  { %1483 = vtanh.f32 %v637_v0  ;;  %v1407_v3 = vmul.f32 -1.442695, %v637_v0 }
 0x77d   :  { %v601_v2 = vpop.f32.mrf.mxu0 }
 0x77e   :  { %v605_v43 = vrot.slane %v601_v2, 5 }
 0x780   :  { %v607_v5 = vadd.f32 %v605_v43, %v1868_v35 }
 0x782   :  { %v1484_v44 = vpop.eup %1483  ;;  %1485 = vtanh.f32 %v607_v5  ;;  %v1406_v7 = vmul.f32 -1.442695, %v607_v5 }
 0x783   :  { %703 = vrot.lane.b32.xlu0 %v1484_v44, %s1639_s15  ;;  %1487 = vpow2.f32 %v1407_v3 }
 0x784   :  { %1489 = vpow2.f32 %v1406_v7 }
 0x788   :  { %v1486_v1 = vpop.eup %1485 }
 0x789   :  { %663 = vrot.lane.b32.xlu1 %v1486_v1, %s1639_s15  ;;  %v1488_v10 = vpop.eup %1487 }
 0x78a   :  { %v681_v11 = vadd.f32 1.0, %v1488_v10  ;;  %v1490_v45 = vpop.eup %1489 }
 0x78b   :  { %v641_v46 = vadd.f32 1.0, %v1490_v45 }
 0x78c   :  { %1491 = vrcp.f32 %v681_v11  ;;  %v693_v55 = vand.u32 2147483648, %v681_v11  ;;  %vm687_vm14 = vweird.f32 %v681_v11  ;;  %v691_v56 = vand.u32 2147483647, %v681_v11 }
 0x78d   :  { %1493 = vrcp.f32 %v641_v46  ;;  %v653_v63 = vand.u32 2147483648, %v641_v46  ;;  %vm647_vm3 = vweird.f32 %v641_v46  ;;  %v651_v6 = vand.u32 2147483647, %v641_v46 }
 0x78e   :  { %v694_v59 = vor.u32 1.1754944e-38, %v693_v55  ;;  %vm692_vm0 = vcmp.eq.f32.partialorder %v691_v56, 8.507059e+37 }
 0x78f   :  { %v654_v9 = vor.u32 1.1754944e-38, %v653_v63  ;;  %vm652_vm5 = vcmp.eq.f32.partialorder %v651_v6, 8.507059e+37 }
 0x792   :  { %v1492_v47 = vpop.eup %1491 }
 0x793   :  { %v683_v48 = vmul.f32 %v1492_v47, %v681_v11  ;;  %v1494_v49 = vpop.eup %1493  ;;  %vm688_vm13 = vweird.f32 %v1492_v47 }
 0x794   :  { %v643_v51 = vmul.f32 %v1494_v49, %v641_v46  ;;  %vm689_vm15 = vmor %vm687_vm14, %vm688_vm13  ;;  %vm648_vm2 = vweird.f32 %v1494_v49 }
 0x795   :  { %v684_v50 = vsub.f32 1.0, %v683_v48  ;;  %vm649_vm4 = vmor %vm647_vm3, %vm648_vm2  ;;  %vm1281_vm2 = vcmask 1043456  }
 0x796   :  { %v644_v53 = vsub.f32 1.0, %v643_v51 }
 0x797   :  { %v685_v52 = vmul.f32 %v1492_v47, %v684_v50 }
 0x798   :  { %v645_v57 = vmul.f32 %v1494_v49, %v644_v53 }
 0x799   :  { %v686_v54 = vadd.f32 %v1492_v47, %v685_v52 }
 0x79a   :  { %v646_v60 = vadd.f32 %v1494_v49, %v645_v57 }
 0x79b   :  { %v690_v58 = vsel %vm689_vm15, %v1492_v47, %v686_v54 }
 0x79c   :  { %v695_v62 = vsel %vm692_vm0, %v694_v59, %v690_v58  ;;  %v650_v8 = vsel %vm649_vm4, %v1494_v49, %v646_v60 }
 0x79d   :  { %v655_v13 = vsel %vm652_vm5, %v654_v9, %v650_v8  ;;  %v701_v18 = vmul.f32 %v699_v15, %v695_v62 }
 0x79e   :  { %v661_v28 = vmul.f32 %v659_v16, %v655_v13 }
 0x7f5   :  { %v704_v61 = vpop.permute.xlu0 %703 }
 0x7f6   :  { %v706_v4 = vmul.f32 %v704_v61, %v695_v62 }
 0x7f8   :  { %708 = vrot.lane.b32.xlu2 %v706_v4, %s1640_s3 }
 0x7fb   :  { %v664_v12 = vpop.permute.xlu1 %663 }
 0x7fc   :  { %v666_v14 = vmul.f32 %v664_v12, %v655_v13 }
 0x7fe   :  { %668 = vrot.lane.b32.xlu0 %v666_v14, %s1640_s3 }
 0x852   :  { %v709_v19 = vpop.permute.xlu2 %708 }
 0x853   :  { %v1979_v21 = vadd.f32 %v709_v19, %v701_v18 }
 0x855   :  { %1495 = vtanh.f32 %v1979_v21 }
 0x85b   :  { %v1496_v24 = vpop.eup %1495 }
 0x85c   :  { %714 = vrot.lane.b32.xlu1 %v1496_v24, %s1639_s15 }
 0x870   :  { %v669_v20 = vpop.permute.xlu0 %668 }
 0x871   :  { %v1984_v31 = vadd.f32 %v669_v20, %v661_v28 }
 0x873   :  { %1497 = vtanh.f32 %v1984_v31  ;;  %v799_v19 = vrot.slane %v1984_v31, 7 }
 0x879   :  { %v1498_v33 = vpop.eup %1497 }
 0x87a   :  { %674 = vrot.lane.b32.xlu2 %v1498_v33, %s1639_s15 }
 0x8ce   :  { %v715_v25 = vpop.permute.xlu1 %714 }
 0x8cf   :  { %v1988_v17 = vmul.f32 %v715_v25, %v695_v62 }
 0x8d1   :  { %v749_v36 = vrot.slane %v1988_v17, 4 }
 0x8d3   :  { %750 = vrot.lane.b32.xlu0 %v749_v36, %s1640_s3 }
 0x8d4   :  { %v675_v22 = vpop.permute.xlu2 %674 }
 0x8d5   :  { %v677_v37 = vmul.f32 %v675_v22, %v655_v13  ;;  %v839_v13 = vrot.slane %v1979_v21, 1 }
 0x8d7   :  { %v719_v30 = vrot.slane %v677_v37, 3  ;;  %v1994_v38 = vsel %vm1279_vm6, %v1959_v40, %v677_v37 }
 0x8d9   :  { %720 = vrot.lane.b32.xlu1 %v719_v30, %s1640_s3 }
 0x945   :  { %v751_v39 = vpop.permute.xlu0 %750 }
 0x946   :  { %1409 = vmatmul.msk.f32.vlgmr.msra.gmra.mxu3 %vm125_vm1, %v751_v39 }
 0x94b   :  { %v721_v41 = vpop.permute.xlu1 %720 }
 0x94c   :  { %1408 = vmatmul.msk.f32.vlgmr.msra.gmra.mxu2 %vm125_vm1, %v721_v41 }
 0x9c9   :  { %v771_v42 = vpop.f32.mrf.mxu3 }
 0x9ca   :  { %v775_v26 = vrot.slane %v771_v42, 5 }
 0x9cc   :  { %v777_v29 = vadd.f32 %v775_v26, %v1865_v32 }
 0x9ce   :  { %1499 = vtanh.f32 %v777_v29  ;;  %v1411_v44 = vmul.f32 -1.442695, %v777_v29 }
 0x9cf   :  { %v741_v0 = vpop.f32.mrf.mxu2 }
 0x9d0   :  { %v745_v2 = vrot.slane %v741_v0, 4 }
 0x9d2   :  { %v747_v43 = vadd.f32 %v745_v2, %v1868_v35 }
 0x9d4   :  { %v1500_v5 = vpop.eup %1499  ;;  %1501 = vtanh.f32 %v747_v43  ;;  %v1410_v11 = vmul.f32 -1.442695, %v747_v43 }
 0x9d5   :  { %843 = vrot.lane.b32.xlu2 %v1500_v5, %s1639_s15  ;;  %1503 = vpow2.f32 %v1411_v44 }
 0x9da   :  { %v1502_v40 = vpop.eup %1501 }
 0x9db   :  { %803 = vrot.lane.b32.xlu0 %v1502_v40, %s1639_s15  ;;  %v1504_v1 = vpop.eup %1503 }
 0x9dc   :  { %v821_v3 = vadd.f32 1.0, %v1504_v1 }
 0x9de   :  { %1505 = vrcp.f32 %v821_v3  ;;  %v833_v48 = vand.u32 2147483648, %v821_v3  ;;  %vm827_vm8 = vweird.f32 %v821_v3  ;;  %v831_v50 = vand.u32 2147483647, %v821_v3 }
 0x9df   :  { %1507 = vpow2.f32 %v1410_v11 }
 0x9e0   :  { %v834_v53 = vor.u32 1.1754944e-38, %v833_v48  ;;  %vm832_vm10 = vcmp.eq.f32.partialorder %v831_v50, 8.507059e+37 }
 0x9e4   :  { %v1506_v7 = vpop.eup %1505 }
 0x9e5   :  { %v823_v10 = vmul.f32 %v1506_v7, %v821_v3  ;;  %vm828_vm7 = vweird.f32 %v1506_v7  ;;  %v1508_v49 = vpop.eup %1507 }
 0x9e6   :  { %vm829_vm9 = vmor %vm827_vm8, %vm828_vm7  ;;  %v781_v52 = vadd.f32 1.0, %v1508_v49 }
 0x9e7   :  { %v824_v45 = vsub.f32 1.0, %v823_v10 }
 0x9e8   :  { %1509 = vrcp.f32 %v781_v52  ;;  %v793_v62 = vand.u32 2147483648, %v781_v52  ;;  %vm787_vm14 = vweird.f32 %v781_v52  ;;  %v791_v63 = vand.u32 2147483647, %v781_v52 }
 0x9e9   :  { %v825_v46 = vmul.f32 %v1506_v7, %v824_v45 }
 0x9ea   :  { %v794_v6 = vor.u32 1.1754944e-38, %v793_v62  ;;  %vm792_vm0 = vcmp.eq.f32.partialorder %v791_v63, 8.507059e+37 }
 0x9eb   :  { %v826_v47 = vadd.f32 %v1506_v7, %v825_v46 }
 0x9ed   :  { %v830_v51 = vsel %vm829_vm9, %v1506_v7, %v826_v47 }
 0x9ee   :  { %v835_v54 = vsel %vm832_vm10, %v834_v53, %v830_v51  ;;  %v1510_v57 = vpop.eup %1509 }
 0x9ef   :  { %v783_v58 = vmul.f32 %v1510_v57, %v781_v52  ;;  %vm788_vm13 = vweird.f32 %v1510_v57  ;;  %v841_v14 = vmul.f32 %v839_v13, %v835_v54 }
 0x9f0   :  { %vm789_vm15 = vmor %vm787_vm14, %vm788_vm13  ;;  %vm1283_vm14 = vcmask 1044480  }
 0x9f1   :  { %v784_v59 = vsub.f32 1.0, %v783_v58 }
 0x9f3   :  { %v785_v60 = vmul.f32 %v1510_v57, %v784_v59 }
 0x9f5   :  { %v786_v61 = vadd.f32 %v1510_v57, %v785_v60 }
 0x9f7   :  { %v790_v4 = vsel %vm789_vm15, %v1510_v57, %v786_v61 }
 0x9f8   :  { %v795_v9 = vsel %vm792_vm0, %v794_v6, %v790_v4 }
 0x9f9   :  { %v801_v24 = vmul.f32 %v799_v19, %v795_v9 }
 0xa2f   :  { %v844_v55 = vpop.permute.xlu2 %843 }
 0xa30   :  { %v846_v56 = vmul.f32 %v844_v55, %v835_v54 }
 0xa32   :  { %848 = vrot.lane.b32.xlu1 %v846_v56, %s1640_s3 }
 0xa4d   :  { %v804_v8 = vpop.permute.xlu0 %803 }
 0xa4e   :  { %v806_v12 = vmul.f32 %v804_v8, %v795_v9 }
 0xa50   :  { %808 = vrot.lane.b32.xlu2 %v806_v12, %s1640_s3 }
 0xaa4   :  { %v849_v15 = vpop.permute.xlu1 %848 }
 0xaa5   :  { %v2006_v18 = vadd.f32 %v849_v15, %v841_v14 }
 0xaa7   :  { %1511 = vtanh.f32 %v2006_v18  ;;  %v979_v12 = vrot.slane %v2006_v18, 1 }
 0xaaa   :  { %v809_v16 = vpop.permute.xlu2 %808 }
 0xaab   :  { %v2010_v28 = vadd.f32 %v809_v16, %v801_v24 }
 0xaad   :  { %v1512_v20 = vpop.eup %1511  ;;  %1513 = vtanh.f32 %v2010_v28  ;;  %v939_v19 = vrot.slane %v2010_v28, 7 }
 0xaae   :  { %854 = vrot.lane.b32.xlu0 %v1512_v20, %s1639_s15 }
 0xab3   :  { %v1514_v33 = vpop.eup %1513 }
 0xab4   :  { %814 = vrot.lane.b32.xlu1 %v1514_v33, %s1639_s15 }
 0xb20   :  { %v855_v21 = vpop.permute.xlu0 %854 }
 0xb21   :  { %v2015_v25 = vmul.f32 %v855_v21, %v835_v54 }
 0xb23   :  { %v889_v36 = vrot.slane %v2015_v25, 3 }
 0xb25   :  { %890 = vrot.lane.b32.xlu2 %v889_v36, %s1640_s3 }
 0xb26   :  { %v815_v31 = vpop.permute.xlu1 %814 }
 0xb27   :  { %v817_v22 = vmul.f32 %v815_v31, %v795_v9 }
 0xb29   :  { %v859_v37 = vrot.slane %v817_v22, 4  ;;  %v2021_v30 = vsel %vm1281_vm2, %v1994_v38, %v817_v22 }
 0xb2b   :  { %860 = vrot.lane.b32.xlu0 %v859_v37, %s1640_s3 }
 0xb7f   :  { %v891_v39 = vpop.permute.xlu2 %890 }
 0xb80   :  { %1413 = vmatmul.msk.f32.vlgmr.msrb.gmra.mxu1 %vm125_vm1, %v891_v39 }
 0xb9d   :  { %v861_v41 = vpop.permute.xlu0 %860 }
 0xb9e   :  { %1412 = vmatmul.msk.f32.vlgmr.msrb.gmra.mxu0 %vm125_vm1, %v861_v41 }
 0xbfd   :  { %v911_v42 = vpop.f32.mrf.mxu1 }
 0xbfe   :  { %v915_v26 = vrot.slane %v911_v42, 6 }
 0xc00   :  { %v917_v29 = vadd.f32 %v915_v26, %v1865_v32 }
 0xc02   :  { %1515 = vtanh.f32 %v917_v29  ;;  %v1415_v40 = vmul.f32 -1.442695, %v917_v29 }
 0xc08   :  { %v1516_v0 = vpop.eup %1515 }
 0xc09   :  { %983 = vrot.lane.b32.xlu1 %v1516_v0, %s1639_s15 }
 0xc1b   :  { %v881_v2 = vpop.f32.mrf.mxu0 }
 0xc1c   :  { %v885_v43 = vrot.slane %v881_v2, 3 }
 0xc1e   :  { %v887_v38 = vadd.f32 %v885_v43, %v1868_v35 }
 0xc20   :  { %1517 = vtanh.f32 %v887_v38  ;;  %v1414_v44 = vmul.f32 -1.442695, %v887_v38 }
 0xc21   :  { %1519 = vpow2.f32 %v1415_v40 }
 0xc22   :  { %1521 = vpow2.f32 %v1414_v44 }
 0xc26   :  { %v1518_v5 = vpop.eup %1517 }
 0xc27   :  { %943 = vrot.lane.b32.xlu2 %v1518_v5, %s1639_s15  ;;  %v1520_v1 = vpop.eup %1519 }
 0xc28   :  { %v961_v3 = vadd.f32 1.0, %v1520_v1  ;;  %v1522_v7 = vpop.eup %1521 }
 0xc29   :  { %v921_v10 = vadd.f32 1.0, %v1522_v7 }
 0xc2a   :  { %1523 = vrcp.f32 %v961_v3  ;;  %v973_v52 = vand.u32 2147483648, %v961_v3  ;;  %vm967_vm4 = vweird.f32 %v961_v3  ;;  %v971_v53 = vand.u32 2147483647, %v961_v3 }
 0xc2b   :  { %1525 = vrcp.f32 %v921_v10  ;;  %v933_v60 = vand.u32 2147483648, %v921_v10  ;;  %vm927_vm9 = vweird.f32 %v921_v10  ;;  %v931_v62 = vand.u32 2147483647, %v921_v10 }
 0xc2c   :  { %v974_v56 = vor.u32 1.1754944e-38, %v973_v52  ;;  %vm972_vm7 = vcmp.eq.f32.partialorder %v971_v53, 8.507059e+37 }
 0xc2d   :  { %v934_v4 = vor.u32 1.1754944e-38, %v933_v60  ;;  %vm932_vm13 = vcmp.eq.f32.partialorder %v931_v62, 8.507059e+37 }
 0xc30   :  { %v1524_v11 = vpop.eup %1523 }
 0xc31   :  { %v963_v45 = vmul.f32 %v1524_v11, %v961_v3  ;;  %v1526_v46 = vpop.eup %1525  ;;  %vm968_vm3 = vweird.f32 %v1524_v11 }
 0xc32   :  { %v923_v48 = vmul.f32 %v1526_v46, %v921_v10  ;;  %vm969_vm5 = vmor %vm967_vm4, %vm968_vm3  ;;  %vm928_vm8 = vweird.f32 %v1526_v46 }
 0xc33   :  { %v964_v47 = vsub.f32 1.0, %v963_v45  ;;  %vm929_vm10 = vmor %vm927_vm9, %vm928_vm8 }
 0xc34   :  { %v924_v50 = vsub.f32 1.0, %v923_v48 }
 0xc35   :  { %v965_v49 = vmul.f32 %v1524_v11, %v964_v47 }
 0xc36   :  { %v925_v54 = vmul.f32 %v1526_v46, %v924_v50 }
 0xc37   :  { %v966_v51 = vadd.f32 %v1524_v11, %v965_v49 }
 0xc38   :  { %v926_v57 = vadd.f32 %v1526_v46, %v925_v54 }
 0xc39   :  { %v970_v55 = vsel %vm969_vm5, %v1524_v11, %v966_v51 }
 0xc3a   :  { %v975_v59 = vsel %vm972_vm7, %v974_v56, %v970_v55  ;;  %v930_v63 = vsel %vm929_vm10, %v1526_v46, %v926_v57  ;;  %vm1285_vm10 = vcmask 1045504  }
 0xc3b   :  { %v935_v6 = vsel %vm932_vm13, %v934_v4, %v930_v63  ;;  %v981_v13 = vmul.f32 %v979_v12, %v975_v59 }
 0xc3c   :  { %v941_v24 = vmul.f32 %v939_v19, %v935_v6 }
 0xc7b   :  { %v984_v58 = vpop.permute.xlu1 %983 }
 0xc7c   :  { %v986_v61 = vmul.f32 %v984_v58, %v975_v59 }
 0xc7e   :  { %988 = vrot.lane.b32.xlu0 %v986_v61, %s1640_s3 }
 0xc81   :  { %v944_v8 = vpop.permute.xlu2 %943 }
 0xc82   :  { %v946_v9 = vmul.f32 %v944_v8, %v935_v6 }
 0xc84   :  { %948 = vrot.lane.b32.xlu1 %v946_v9, %s1640_s3 }
 0xcf0   :  { %v989_v14 = vpop.permute.xlu0 %988 }
 0xcf1   :  { %v2033_v15 = vadd.f32 %v989_v14, %v981_v13 }
 0xcf3   :  { %1527 = vtanh.f32 %v2033_v15  ;;  %v1119_v12 = vrot.slane %v2033_v15, 1 }
 0xcf6   :  { %v949_v16 = vpop.permute.xlu1 %948 }
 0xcf7   :  { %v2037_v20 = vadd.f32 %v949_v16, %v941_v24 }
 0xcf9   :  { %v1528_v33 = vpop.eup %1527  ;;  %1529 = vtanh.f32 %v2037_v20  ;;  %v1079_v16 = vrot.slane %v2037_v20, 7 }
 0xcfa   :  { %994 = vrot.lane.b32.xlu2 %v1528_v33, %s1639_s15 }
 0xcff   :  { %v1530_v21 = vpop.eup %1529 }
 0xd00   :  { %954 = vrot.lane.b32.xlu0 %v1530_v21, %s1639_s15 }
 0xd54   :  { %v995_v18 = vpop.permute.xlu2 %994 }
 0xd55   :  { %v2042_v36 = vmul.f32 %v995_v18, %v975_v59 }
 0xd57   :  { %v1029_v31 = vrot.slane %v2042_v36, 2 }
 0xd59   :  { %1030 = vrot.lane.b32.xlu1 %v1029_v31, %s1640_s3 }
 0xd72   :  { %v955_v28 = vpop.permute.xlu0 %954 }
 0xd73   :  { %v957_v22 = vmul.f32 %v955_v28, %v935_v6 }
 0xd75   :  { %v999_v37 = vrot.slane %v957_v22, 5  ;;  %v2048_v39 = vsel %vm1283_vm14, %v2021_v30, %v957_v22 }
 0xd77   :  { %1000 = vrot.lane.b32.xlu2 %v999_v37, %s1640_s3 }
 0xdcb   :  { %v1031_v41 = vpop.permute.xlu1 %1030 }
 0xdcc   :  { %1417 = vmatmul.msk.f32.vlgmr.msrb.gmra.mxu3 %vm125_vm1, %v1031_v41 }
 0xdd1   :  { %v1001_v42 = vpop.permute.xlu2 %1000 }
 0xdd2   :  { %1416 = vmatmul.msk.f32.vlgmr.msrb.gmra.mxu2 %vm125_vm1, %v1001_v42 }
 0xe4f   :  { %v1051_v26 = vpop.f32.mrf.mxu3 }
 0xe50   :  { %v1055_v29 = vrot.slane %v1051_v26, 7 }
 0xe52   :  { %v1057_v0 = vadd.f32 %v1055_v29, %v1865_v32 }
 0xe54   :  { %1531 = vtanh.f32 %v1057_v0  ;;  %v1419_v40 = vmul.f32 -1.442695, %v1057_v0 }
 0xe55   :  { %v1021_v2 = vpop.f32.mrf.mxu2 }
 0xe56   :  { %v1025_v43 = vrot.slane %v1021_v2, 2 }
 0xe58   :  { %v1027_v38 = vadd.f32 %v1025_v43, %v1868_v35 }
 0xe5a   :  { %v1532_v5 = vpop.eup %1531  ;;  %1533 = vtanh.f32 %v1027_v38  ;;  %v1418_v44 = vmul.f32 -1.442695, %v1027_v38 }
 0xe5b   :  { %1123 = vrot.lane.b32.xlu0 %v1532_v5, %s1639_s15  ;;  %1535 = vpow2.f32 %v1419_v40 }
 0xe5c   :  { %1537 = vpow2.f32 %v1418_v44 }
 0xe60   :  { %v1534_v30 = vpop.eup %1533 }
 0xe61   :  { %1083 = vrot.lane.b32.xlu1 %v1534_v30, %s1639_s15  ;;  %v1536_v1 = vpop.eup %1535 }
 0xe62   :  { %v1101_v3 = vadd.f32 1.0, %v1536_v1  ;;  %v1538_v7 = vpop.eup %1537 }
 0xe63   :  { %v1061_v10 = vadd.f32 1.0, %v1538_v7 }
 0xe64   :  { %1539 = vrcp.f32 %v1101_v3  ;;  %v1113_v52 = vand.u32 2147483648, %v1101_v3  ;;  %vm1107_vm0 = vweird.f32 %v1101_v3  ;;  %v1111_v53 = vand.u32 2147483647, %v1101_v3 }
 0xe65   :  { %1541 = vrcp.f32 %v1061_v10  ;;  %v1073_v60 = vand.u32 2147483648, %v1061_v10  ;;  %vm1067_vm7 = vweird.f32 %v1061_v10  ;;  %v1071_v62 = vand.u32 2147483647, %v1061_v10 }
 0xe66   :  { %v1114_v56 = vor.u32 1.1754944e-38, %v1113_v52  ;;  %vm1112_vm4 = vcmp.eq.f32.partialorder %v1111_v53, 8.507059e+37 }
 0xe67   :  { %v1074_v4 = vor.u32 1.1754944e-38, %v1073_v60  ;;  %vm1072_vm9 = vcmp.eq.f32.partialorder %v1071_v62, 8.507059e+37 }
 0xe6a   :  { %v1540_v11 = vpop.eup %1539 }
 0xe6b   :  { %v1103_v45 = vmul.f32 %v1540_v11, %v1101_v3  ;;  %v1542_v46 = vpop.eup %1541  ;;  %vm1108_vm15 = vweird.f32 %v1540_v11 }
 0xe6c   :  { %v1063_v48 = vmul.f32 %v1542_v46, %v1061_v10  ;;  %vm1109_vm3 = vmor %vm1107_vm0, %vm1108_vm15  ;;  %vm1068_vm5 = vweird.f32 %v1542_v46 }
 0xe6d   :  { %v1104_v47 = vsub.f32 1.0, %v1103_v45  ;;  %vm1069_vm8 = vmor %vm1067_vm7, %vm1068_vm5 }
 0xe6e   :  { %v1064_v50 = vsub.f32 1.0, %v1063_v48 }
 0xe6f   :  { %v1105_v49 = vmul.f32 %v1540_v11, %v1104_v47 }
 0xe70   :  { %v1065_v54 = vmul.f32 %v1542_v46, %v1064_v50 }
 0xe71   :  { %v1106_v51 = vadd.f32 %v1540_v11, %v1105_v49 }
 0xe72   :  { %v1066_v57 = vadd.f32 %v1542_v46, %v1065_v54 }
 0xe73   :  { %v1110_v55 = vsel %vm1109_vm3, %v1540_v11, %v1106_v51 }
 0xe74   :  { %v1115_v59 = vsel %vm1112_vm4, %v1114_v56, %v1110_v55  ;;  %v1070_v63 = vsel %vm1069_vm8, %v1542_v46, %v1066_v57 }
 0xe75   :  { %v1075_v8 = vsel %vm1072_vm9, %v1074_v4, %v1070_v63  ;;  %v1121_v13 = vmul.f32 %v1119_v12, %v1115_v59  ;;  %vm1287_vm9 = vcmask 1046528  }
 0xe76   :  { %v1081_v33 = vmul.f32 %v1079_v16, %v1075_v8 }
 0xecd   :  { %v1124_v58 = vpop.permute.xlu0 %1123 }
 0xece   :  { %v1126_v61 = vmul.f32 %v1124_v58, %v1115_v59 }
 0xed0   :  { %1128 = vrot.lane.b32.xlu2 %v1126_v61, %s1640_s3 }
 0xed3   :  { %v1084_v6 = vpop.permute.xlu1 %1083 }
 0xed4   :  { %v1086_v9 = vmul.f32 %v1084_v6, %v1075_v8 }
 0xed6   :  { %1088 = vrot.lane.b32.xlu0 %v1086_v9, %s1640_s3 }
 0xf2a   :  { %v1129_v14 = vpop.permute.xlu2 %1128 }
 0xf2b   :  { %v2060_v19 = vadd.f32 %v1129_v14, %v1121_v13 }
 0xf2d   :  { %1543 = vtanh.f32 %v2060_v19 }
 0xf33   :  { %v1544_v24 = vpop.eup %1543 }
 0xf34   :  { %1134 = vrot.lane.b32.xlu1 %v1544_v24, %s1639_s15 }
 0xf48   :  { %v1089_v21 = vpop.permute.xlu0 %1088 }
 0xf49   :  { %v2065_v18 = vadd.f32 %v1089_v21, %v1081_v33 }
 0xf4b   :  { %1545 = vtanh.f32 %v2065_v18  ;;  %v1216_v14 = vrot.slane %v2065_v18, 7 }
 0xf51   :  { %v1546_v31 = vpop.eup %1545 }
 0xf52   :  { %1094 = vrot.lane.b32.xlu2 %v1546_v31, %s1639_s15 }
 0xfa6   :  { %v1135_v15 = vpop.permute.xlu1 %1134 }
 0xfa7   :  { %v2069_v28 = vmul.f32 %v1135_v15, %v1115_v59  ;;  %v1303_v15 = vld [vmem:[#allocation7 + $0x18] sm:$0xff] }
 0xfa8   :  { %1321 = vmatpush.msra.mxu2 %v1303_v15 }
 0xfa9   :  { %v1169_v22 = vrot.slane %v2069_v28, 1 }
 0xfab   :  { %1170 = vrot.lane.b32.xlu0 %v1169_v22, %s1640_s3  ;;  %v1302_v22 = vld [vmem:[#allocation7 + $0x10] sm:$0xff] }
 0xfac   :  { %v1095_v37 = vpop.permute.xlu2 %1094  ;;  %1322 = vmatpush.msra.mxu2 %v1302_v22 }
 0xfad   :  { %v1097_v41 = vmul.f32 %v1095_v37, %v1075_v8  ;;  %v1256_v8 = vrot.slane %v2060_v19, 1  ;;  %v1301_v19 = vld [vmem:[#allocation7 + $0x8] sm:$0xff]  ;;  %v1300_v37 = vld [vmem:[#allocation7] sm:$0xff] }
 0xfae   :  { %1323 = vmatpush.msra.mxu2 %v1301_v19 }
 0xfaf   :  { %v1139_v20 = vrot.slane %v1097_v41, 6  ;;  %v2075_v42 = vsel %vm1285_vm10, %v2048_v39, %v1097_v41 }
 0xfb0   :  { %1324 = vmatpush.msra.mxu2 %v1300_v37 }
 0xfb1   :  { %1140 = vrot.lane.b32.xlu1 %v1139_v20, %s1640_s3 }
0x101d   :  { %v1171_v26 = vpop.permute.xlu0 %1170 }
0x101e   :  { %1421 = vmatmul.msk.f32.vlgmr.msra.gmra.mxu1 %vm125_vm1, %v1171_v26 }
0x1023   :  { %v1141_v29 = vpop.permute.xlu1 %1140 }
0x1024   :  { %1420 = vmatmul.msk.f32.vlgmr.msra.gmra.mxu0 %vm125_vm1, %v1141_v29 }
0x109b   :  { %v1191_v0 = vpop.f32.mrf.mxu1 }
0x109c   :  { %v1194_v2 = vadd.f32 %v1191_v0, %v1865_v32 }
0x109e   :  { %1547 = vtanh.f32 %v1194_v2  ;;  %v1423_v40 = vmul.f32 -1.442695, %v1194_v2 }
0x10a1   :  { %v1161_v43 = vpop.f32.mrf.mxu0 }
0x10a2   :  { %v1165_v38 = vrot.slane %v1161_v43, 1 }
0x10a4   :  { %v1548_v5 = vpop.eup %1547  ;;  %v1167_v30 = vadd.f32 %v1165_v38, %v1868_v35 }
0x10a5   :  { %1260 = vrot.lane.b32.xlu2 %v1548_v5, %s1639_s15 }
0x10a6   :  { %1549 = vtanh.f32 %v1167_v30  ;;  %v1422_v10 = vmul.f32 -1.442695, %v1167_v30  ;;  %v1298_v30 = vld [vmem:[#allocation6 + $0x10] sm:$0xff] }
0x10a7   :  { %1551 = vpow2.f32 %v1423_v40 }
0x10ac   :  { %v1550_v39 = vpop.eup %1549 }
0x10ad   :  { %1220 = vrot.lane.b32.xlu0 %v1550_v39, %s1639_s15  ;;  %v1552_v44 = vpop.eup %1551  ;;  %v1296_v39 = vld [vmem:[#allocation6] sm:$0xff] }
0x10ae   :  { %v1238_v1 = vadd.f32 1.0, %v1552_v44 }
0x10b0   :  { %1553 = vrcp.f32 %v1238_v1  ;;  %v1250_v35 = vand.u32 2147483648, %v1238_v1  ;;  %vm1244_vm15 = vweird.f32 %v1238_v1  ;;  %v1248_v46 = vand.u32 2147483647, %v1238_v1 }
0x10b1   :  { %1555 = vpow2.f32 %v1422_v10 }
0x10b2   :  { %v1251_v49 = vor.u32 1.1754944e-38, %v1250_v35  ;;  %vm1249_vm3 = vcmp.eq.f32.partialorder %v1248_v46, 8.507059e+37 }
0x10b6   :  { %v1554_v3 = vpop.eup %1553 }
0x10b7   :  { %v1240_v7 = vmul.f32 %v1554_v3, %v1238_v1  ;;  %vm1245_vm13 = vweird.f32 %v1554_v3  ;;  %v1556_v47 = vpop.eup %1555 }
0x10b8   :  { %vm1246_vm0 = vmor %vm1244_vm15, %vm1245_vm13  ;;  %v1198_v50 = vadd.f32 1.0, %v1556_v47 }
0x10b9   :  { %v1241_v32 = vsub.f32 1.0, %v1240_v7 }
0x10ba   :  { %1557 = vrcp.f32 %v1198_v50  ;;  %v1210_v59 = vand.u32 2147483648, %v1198_v50  ;;  %vm1204_vm5 = vweird.f32 %v1198_v50  ;;  %v1208_v60 = vand.u32 2147483647, %v1198_v50 }
0x10bb   :  { %v1242_v11 = vmul.f32 %v1554_v3, %v1241_v32 }
0x10bc   :  { %v1211_v62 = vor.u32 1.1754944e-38, %v1210_v59  ;;  %vm1209_vm8 = vcmp.eq.f32.partialorder %v1208_v60, 8.507059e+37 }
0x10bd   :  { %v1243_v45 = vadd.f32 %v1554_v3, %v1242_v11 }
0x10bf   :  { %v1247_v48 = vsel %vm1246_vm0, %v1554_v3, %v1243_v45 }
0x10c0   :  { %v1252_v51 = vsel %vm1249_vm3, %v1251_v49, %v1247_v48  ;;  %v1558_v54 = vpop.eup %1557 }
0x10c1   :  { %v1200_v55 = vmul.f32 %v1558_v54, %v1198_v50  ;;  %vm1205_vm4 = vweird.f32 %v1558_v54  ;;  %v1258_v9 = vmul.f32 %v1256_v8, %v1252_v51 }
0x10c2   :  { %vm1206_vm7 = vmor %vm1204_vm5, %vm1205_vm4 }
0x10c3   :  { %v1201_v56 = vsub.f32 1.0, %v1200_v55 }
0x10c5   :  { %v1202_v57 = vmul.f32 %v1558_v54, %v1201_v56 }
0x10c7   :  { %v1203_v58 = vadd.f32 %v1558_v54, %v1202_v57 }
0x10c9   :  { %v1207_v61 = vsel %vm1206_vm7, %v1558_v54, %v1203_v58 }
0x10ca   :  { %v1212_v4 = vsel %vm1209_vm8, %v1211_v62, %v1207_v61 }
0x10cb   :  { %v1218_v24 = vmul.f32 %v1216_v14, %v1212_v4 }
0x10ff   :  { %v1261_v52 = vpop.permute.xlu2 %1260 }
0x1100   :  { %v1263_v53 = vmul.f32 %v1261_v52, %v1252_v51 }
0x1102   :  { %1265 = vrot.lane.b32.xlu1 %v1263_v53, %s1640_s3 }
0x111f   :  { %v1221_v63 = vpop.permute.xlu0 %1220 }
0x1120   :  { %v1223_v6 = vmul.f32 %v1221_v63, %v1212_v4 }
0x1122   :  { %1225 = vrot.lane.b32.xlu2 %v1223_v6, %s1640_s3 }
0x1174   :  { %v1266_v12 = vpop.permute.xlu1 %1265 }
0x1175   :  { %v1268_v13 = vadd.f32 %v1266_v12, %v1258_v9 }
0x1177   :  { %1559 = vtanh.f32 %v1268_v13 }
0x117c   :  { %v1226_v16 = vpop.permute.xlu2 %1225 }
0x117d   :  { %v1560_v33 = vpop.eup %1559  ;;  %v1228_v21 = vadd.f32 %v1226_v16, %v1218_v24 }
0x117e   :  { %1271 = vrot.lane.b32.xlu0 %v1560_v33, %s1639_s15 }
0x117f   :  { %1561 = vtanh.f32 %v1228_v21 }
0x1185   :  { %v1562_v31 = vpop.eup %1561 }
0x1186   :  { %1231 = vrot.lane.b32.xlu1 %v1562_v31, %s1639_s15 }
0x11f0   :  { %v1272_v41 = vpop.permute.xlu0 %1271 }
0x11f1   :  { %v1274_v18 = vmul.f32 %v1272_v41, %v1252_v51 }
0x11f3   :  { %v1289_v20 = vsel %vm1275_vm11, %v1274_v18, %v2069_v28 }
0x11f4   :  { %v1290_v26 = vsel %vm1277_vm12, %v1289_v20, %v2042_v36 }
0x11f5   :  { %v1291_v29 = vsel %vm1279_vm6, %v1290_v26, %v2015_v25  ;;  %v1299_v25 = vld [vmem:[#allocation6 + $0x18] sm:$0xff] }
0x11f6   :  { %v1292_v0 = vsel %vm1281_vm2, %v1291_v29, %v1988_v17  ;;  %1346 = vmatpush.msra.mxu3 %v1299_v25  ;;  %v1297_v17 = vld [vmem:[#allocation6 + $0x8] sm:$0xff] }
0x11f7   :  { %v1293_v2 = vsel %vm1283_vm14, %v1292_v0, %v1951_v34 }
0x11f8   :  { %v1232_v43 = vpop.permute.xlu1 %1231  ;;  %v1294_v38 = vsel %vm1285_vm10, %v1293_v2, %v1917_v27  ;;  %1347 = vmatpush.msra.mxu3 %v1298_v30 }
0x11f9   :  { %v1234_v5 = vmul.f32 %v1232_v43, %v1212_v4  ;;  %v1295_v28 = vsel %vm1287_vm9, %v1294_v38, %v1883_v23  ;;  %v1434_v23 = vld [vmem:[%s2122_s8] ss:$0 sm:$0xff] }
0x11fa   :  { %1305 = vrot.lane.b32.xlu2 %v1295_v28, %s1640_s3  ;;  %1348 = vmatpush.msra.mxu3 %v1297_v17 }
0x11fb   :  { %v1288_v36 = vsel %vm1287_vm9, %v2075_v42, %v1234_v5 }
0x11fc   :  { %1330 = vrot.lane.b32.xlu0 %v1288_v36, %s1640_s3  ;;  %1349 = vmatpush.msra.mxu3 %v1296_v39 }
0x1254   :  { %v1306_v34 = vpop.permute.xlu2 %1305 }
0x1255   :  { %1424 = vmatmul.msk.f32.vlgmr.msra.gmra.mxu2 %vm125_vm1, %v1306_v34 }
0x126e   :  { %v1331_v27 = vpop.permute.xlu0 %1330 }
0x126f   :  { %1425 = vmatmul.msk.f32.vlgmr.msra.gmra.mxu3 %vm125_vm1, %v1331_v27 }
0x12d8   :  { %v1326_v42 = vpop.f32.mrf.mxu2 }
0x12f2   :  { %v1351_v40 = vpop.f32.mrf.mxu3 }
0x12f3   :  { %v1352_v44 = vadd.f32 %v1351_v40, %v1326_v42 }
0x12f5   :  { %v1358_v1 = vadd.f32 %v1434_v23, %v1352_v44 }
0x12f7   :  { %1359 = vmax.xlane.f32.xlu1 %v1358_v1 }
0x136a   :  { %v1360_v3 = vpop.xlane.xlu1 %1359 }
0x136b   :  { %v1361_v7 = vsub.f32 %v1358_v1, %v1360_v3 }
0x136d   :  { %v1362_v32 = vmul.f32 1.442695, %v1361_v7 }
0x136f   :  { %1563 = vpow2.f32 %v1362_v32 }
0x1375   :  { %v1564_v10 = vpop.eup %1563 }
0x1376   :  { %1364 = vadd.xlane.f32.xlu2 %v1564_v10 }
0x13e9   :  { %v1365_v11 = vpop.xlane.xlu2 %1364 }
0x13ea   :  { %1565 = vlog2.f32 %v1365_v11 }
0x13f0   :  { %v1566_v45 = vpop.eup %1565 }
0x13f1   :  { %v1367_v35 = vmul.f32 0.6931472, %v1566_v45 }
0x13f3   :  { %v1368_v46 = vsub.f32 %v1361_v7, %v1367_v35 }
0x13f5   :  { %1369 = vst [vmem:[%s2123_s9] sm:$0xff] %v1368_v46 }
0x13f6   :  { %1374 = vsyncpa [#allocation4], 1 }
0x13f7   :  { %1375 = vsyncpa [#allocation8], 1 }
0x13f8   :  { %1376 = vsyncpa [#allocation5], 1 }

</bundles_post_ra>
